<compile_context>
chip_gen: v7x
topology: tpu7x:2x2x1
jax: 0.10.0
libtpu: 0.0.40
codegen_flags: <defaults>
</compile_context>

<pallas_src>
import functools

import numpy as np
import jax
import jax.numpy as jnp
from jax import lax
from jax.experimental import pallas as pl
from jax.experimental.pallas import tpu as pltpu

LANE = 128


# ----------------------- schedule construction (host-side glue) -----------------------

def clip_noise_schedule(alphas2, clip_value=0.001):
    alphas2 = np.concatenate([np.ones(1), alphas2], axis=0)
    alphas_step = alphas2[1:] / alphas2[:-1]
    alphas_step = np.clip(alphas_step, a_min=clip_value, a_max=1.0)
    alphas2 = np.cumprod(alphas_step, axis=0)
    return alphas2


def polynomial_schedule(timesteps: int, s=0.0001, power=3.0):
    steps = timesteps + 1
    x = np.linspace(0, steps, steps)
    alphas2 = (1 - np.power(x / steps, power)) ** 2
    alphas2 = clip_noise_schedule(alphas2, clip_value=0.001)
    precision = 1 - 2 * s
    alphas2 = precision * alphas2 + s
    return alphas2


def _sigmoid_np(x):
    return 1 / (np.exp(-x) + 1)


def build_gamma_table(noise_schedule: str, timestep: int, precision: float) -> np.ndarray:
    """Deterministic reproduction of NoiseSchedule.__init__ (gamma parameter)."""
    if 'polynomial' in noise_schedule:
        power = float(noise_schedule.split('_')[1])
        alphas2 = polynomial_schedule(timestep, s=precision, power=power)
    elif noise_schedule == 'sigmoid':
        betas = np.linspace(-6, 6, timestep + 1)
        betas = _sigmoid_np(betas)
        alphas = np.cumprod(1.0 - betas, axis=0)
        alphas2 = alphas ** 2
    else:
        raise ValueError(noise_schedule)
    sigmas2 = 1 - alphas2
    log_alphas2 = np.log(alphas2)
    log_sigmas2 = np.log(sigmas2)
    log_alphas2_to_sigmas2 = log_alphas2 - log_sigmas2
    gamma = (-log_alphas2_to_sigmas2).astype(np.float32)  # shape (timestep + 1,)
    return gamma


# ----------------------------------- Pallas kernels ------------------------------------

def _noise_gather_kernel(gamma_ref, t_ref, o_ref, *, timestep: int):
    """Fast path: per-vreg dynamic lane gather from the (n_chunks, 128) gamma table.

    gamma_ref: (n_chunks, 128) f32  (128-padded table, chunk-major)
    t_ref:     (TM, 128)       f32  normalized times
    o_ref:     (TM, 128)       f32  gamma[round(t * timestep)]
    """
    t = t_ref[...]
    # torch.round == round-half-to-even == jnp.round; clamp to valid table range.
    t_int = jnp.clip(jnp.round(t * float(timestep)).astype(jnp.int32), 0, timestep)

    tm, lanes = t.shape
    n_chunks = gamma_ref.shape[0]
    gamma_all = gamma_ref[...]                                  # tiny, stays in vregs

    if n_chunks == 1:
        # Whole table fits the 128 lanes of one vreg: single lane-gather per vreg.
        src = jnp.broadcast_to(gamma_all, (tm, lanes))           # each row = full table
        o_ref[...] = jnp.take_along_axis(
            src, t_int, axis=-1, mode="promise_in_bounds").astype(o_ref.dtype)
    else:
        # Table wider than 128: one gather + select per 128-entry chunk (static loop).
        out = jnp.zeros((tm, lanes), jnp.float32)
        for c in range(n_chunks):
            src = jnp.broadcast_to(gamma_all[c:c + 1, :], (tm, lanes))
            local = t_int - c * lanes
            in_chunk = (local >= 0) & (local < lanes)
            local_c = jnp.clip(local, 0, lanes - 1)
            g = jnp.take_along_axis(src, local_c, axis=-1, mode="promise_in_bounds")
            out = jnp.where(in_chunk, g, out)
        o_ref[...] = out.astype(o_ref.dtype)


def _noise_onehot_kernel(gamma_ref, t_ref, o_ref, *, timestep: int):
    """Fallback path (known-good lowering): one-hot compare + lane reduce.

    gamma_ref: (1, T_pad) f32, t_ref/o_ref: (TM, 128) f32.  Only used if the
    dynamic-gather lowering is unavailable; run with small TM (8).
    """
    t = t_ref[...]
    t_int = jnp.clip(jnp.round(t * float(timestep)).astype(jnp.int32), 0, timestep)
    tm, tn = t.shape
    t_pad = gamma_ref.shape[1]
    iota = lax.broadcasted_iota(jnp.int32, (tm, tn, t_pad), 2)
    onehot = (t_int[:, :, None] == iota)
    gamma = gamma_ref[0, :]
    o_ref[...] = jnp.sum(
        jnp.where(onehot, gamma[None, None, :], 0.0), axis=-1).astype(o_ref.dtype)


# ----------------------------------- wrapper -------------------------------------------

def _round_up(x: int, m: int) -> int:
    return ((x + m - 1) // m) * m


def noise_schedule_forward(t: jax.Array, gamma_table: jax.Array, timestep: int,
                           *, max_block_rows: int = 2048) -> jax.Array:
    """Pallas implementation of NoiseSchedule.forward: gamma[round(t * timestep)].

    t:           any shape, float; gamma_table: (timestep + 1,) float32.
    returns:     same shape as t, float32.
    """
    orig_shape = t.shape
    t_flat = jnp.ravel(t).astype(jnp.float32)
    total = t_flat.shape[0]

    # --- gamma table, padded to lane multiples (pad with the last entry) ---
    table_len = timestep + 1
    n_chunks = max(1, pl.cdiv(table_len, LANE))
    t_pad_len = n_chunks * LANE
    gamma_flat = gamma_table.astype(jnp.float32).reshape(-1)
    if t_pad_len > table_len:
        gamma_flat = jnp.concatenate(
            [gamma_flat, jnp.full((t_pad_len - table_len,), gamma_flat[-1], jnp.float32)])
    gamma2d = gamma_flat.reshape(n_chunks, LANE)                 # for gather kernel
    gamma_row = gamma_flat.reshape(1, t_pad_len)                 # for one-hot fallback

    # --- lane-dense retiling of t: (rows, 128), large row blocks, >=2 grid steps ---
    rows = pl.cdiv(total, LANE)
    rows8 = _round_up(rows, 8)
    block_rows = min(max_block_rows, rows8)
    grid_rows = pl.cdiv(rows8, block_rows)
    if grid_rows == 1 and rows8 >= 16:
        grid_rows = 2                                            # feed both v7x TCs
    block_rows = _round_up(pl.cdiv(rows8, grid_rows), 8)
    grid_rows = pl.cdiv(rows8, block_rows)
    padded_rows = grid_rows * block_rows

    pad_amount = padded_rows * LANE - total
    t_padded = jnp.pad(t_flat, (0, pad_amount)) if pad_amount else t_flat
    t2d = t_padded.reshape(padded_rows, LANE)

    def run(kernel_fn, blk_rows, gamma_arr):
        grid = (padded_rows // blk_rows,)
        return pl.pallas_call(
            functools.partial(kernel_fn, timestep=timestep),
            out_shape=jax.ShapeDtypeStruct((padded_rows, LANE), jnp.float32),
            grid_spec=pltpu.PrefetchScalarGridSpec(
                num_scalar_prefetch=0,
                grid=grid,
                in_specs=[
                    pl.BlockSpec(gamma_arr.shape, lambda i: (0, 0)),       # resident table
                    pl.BlockSpec((blk_rows, LANE), lambda i: (i, 0)),       # t block
                ],
                out_specs=pl.BlockSpec((blk_rows, LANE), lambda i: (i, 0)),
            ),
            compiler_params=pltpu.CompilerParams(
                dimension_semantics=("parallel",)),
        )(gamma_arr, t2d)

    try:
        out2d = jax.block_until_ready(run(_noise_gather_kernel, block_rows, gamma2d))
    except Exception:
        # TODO(synk): drop this fallback once dynamic lane-gather lowering is guaranteed
        # in the deployed JAX; the one-hot kernel is the previously-validated path.
        out2d = jax.block_until_ready(run(_noise_onehot_kernel, 8, gamma_row))

    return out2d.reshape(-1)[:total].reshape(orig_shape)


# --------------------------------------- main -----------------------------------------

if __name__ == "__main__":
    noise_schedule = "polynomial_2"
    timestep = 100
    precision = 1e-4

    gamma_np = build_gamma_table(noise_schedule, timestep, precision)  # (101,)
    gamma_table = jnp.asarray(gamma_np)

    # t: normalized timesteps in [0, 1], shape (B, N)
    key = jax.random.PRNGKey(0)
    B, N = 8, 256
    t = jax.random.uniform(key, (B, N), dtype=jnp.float32)

    out = noise_schedule_forward(t, gamma_table, timestep)
    out = jax.block_until_ready(out)

    # Reference check (pure numpy, mirrors the PyTorch forward).
    t_np = np.asarray(t)
    t_int_ref = np.round(t_np * timestep).astype(np.int64)
    ref = gamma_np[t_int_ref]
    np.testing.assert_allclose(np.asarray(out), ref, rtol=1e-6, atol=1e-6)

    print("KERNEL_OK")
</pallas_src>

<mosaic_0001>
module attributes {stable_mosaic.version = 11 : i64} {
  func.func @_noise_gather_kernel(%arg0: i32, %arg1: memref<1x128xf32, #tpu.memory_space<vmem>>, %arg2: memref<8x128xf32, #tpu.memory_space<vmem>>, %arg3: memref<8x128xf32, #tpu.memory_space<vmem>>) attributes {dimension_semantics = [#tpu.dimension_semantics<parallel>], iteration_bounds = array<i64: 2>, scalar_prefetch = 0 : i64, scratch_operands = 0 : i64, tpu.core_type = #tpu.core_type<tc>, window_params = [{pipeline_mode = #tpu.pipeline_mode<synchronous>, transform_indices = @transform_0, window_bounds = array<i64: 1, 128>}, {transform_indices = @transform_1, window_bounds = array<i64: 8, 128>}, {transform_indices = @transform_2, window_bounds = array<i64: 8, 128>}]} {
    %c0 = arith.constant 0 : index
    %c0_0 = arith.constant 0 : index
    %0 = vector.load %arg2[%c0, %c0_0] : memref<8x128xf32, #tpu.memory_space<vmem>>, vector<8x128xf32>
    %cst = arith.constant 1.000000e+02 : f32
    %1 = vector.broadcast %cst : f32 to vector<8x128xf32>
    %2 = arith.mulf %0, %1 : vector<8x128xf32>
    %3 = math.roundeven %2 : vector<8x128xf32>
    %4 = arith.fptosi %3 : vector<8x128xf32> to vector<8x128xi32>
    %c0_i32 = arith.constant 0 : i32
    %c100_i32 = arith.constant 100 : i32
    %5 = vector.broadcast %c0_i32 : i32 to vector<8x128xi32>
    %6 = arith.maxsi %5, %4 : vector<8x128xi32>
    %7 = vector.broadcast %c100_i32 : i32 to vector<8x128xi32>
    %8 = arith.minsi %7, %6 : vector<8x128xi32>
    %c0_1 = arith.constant 0 : index
    %c0_2 = arith.constant 0 : index
    %9 = vector.load %arg1[%c0_1, %c0_2] : memref<1x128xf32, #tpu.memory_space<vmem>>, vector<1x128xf32>
    %10 = vector.shape_cast %9 : vector<1x128xf32> to vector<1x128xf32>
    %11 = vector.broadcast %10 : vector<1x128xf32> to vector<8x128xf32>
    %12 = vector.shape_cast %8 : vector<8x128xi32> to vector<8x128x1xi32>
    %13 = vector.shape_cast %12 : vector<8x128x1xi32> to vector<8x128xi32>
    %14 = tpu.dynamic_gather %11[%13] in [1] : vector<8x128xf32>, vector<8x128xi32> -> vector<8x128xf32>
    %c0_3 = arith.constant 0 : index
    %c0_4 = arith.constant 0 : index
    %15 = vector.load %arg3[%c0_3, %c0_4] : memref<8x128xf32, #tpu.memory_space<vmem>>, vector<8x128xf32>
    tpu.vector_store %arg3[%c0_3, %c0_4], %14 {strides = array<i32>} : memref<8x128xf32, #tpu.memory_space<vmem>>, vector<8x128xf32>,
    return
  }
  func.func @transform_0(%arg0: i32) -> (i32, i32) {
    %c0_i32 = arith.constant 0 : i32
    %c0_i32_0 = arith.constant 0 : i32
    %c0_i32_1 = arith.constant 0 : i32
    return %c0_i32, %c0_i32_0 : i32, i32
  }
  func.func @transform_1(%arg0: i32) -> (i32, i32) {
    %c0_i32 = arith.constant 0 : i32
    %c0_i32_0 = arith.constant 0 : i32
    return %arg0, %c0_i32 : i32, i32
  }
  func.func @transform_2(%arg0: i32) -> (i32, i32) {
    %c0_i32 = arith.constant 0 : i32
    %c0_i32_0 = arith.constant 0 : i32
    return %arg0, %c0_i32 : i32, i32
  }
}

module attributes {stable_mosaic.version = 11 : i64} {
  func.func @_noise_onehot_kernel(%arg0: i32, %arg1: memref<1x128xf32, #tpu.memory_space<vmem>>, %arg2: memref<8x128xf32, #tpu.memory_space<vmem>>, %arg3: memref<8x128xf32, #tpu.memory_space<vmem>>) attributes {dimension_semantics = [#tpu.dimension_semantics<parallel>], iteration_bounds = array<i64: 2>, scalar_prefetch = 0 : i64, scratch_operands = 0 : i64, tpu.core_type = #tpu.core_type<tc>, window_params = [{pipeline_mode = #tpu.pipeline_mode<synchronous>, transform_indices = @transform_0, window_bounds = array<i64: 1, 128>}, {transform_indices = @transform_1, window_bounds = array<i64: 8, 128>}, {transform_indices = @transform_2, window_bounds = array<i64: 8, 128>}]} {
    %c0 = arith.constant 0 : index
    %c0_0 = arith.constant 0 : index
    %0 = vector.load %arg2[%c0, %c0_0] : memref<8x128xf32, #tpu.memory_space<vmem>>, vector<8x128xf32>
    %cst = arith.constant 1.000000e+02 : f32
    %1 = vector.broadcast %cst : f32 to vector<8x128xf32>
    %2 = arith.mulf %0, %1 : vector<8x128xf32>
    %3 = math.roundeven %2 : vector<8x128xf32>
    %4 = arith.fptosi %3 : vector<8x128xf32> to vector<8x128xi32>
    %c0_i32 = arith.constant 0 : i32
    %c100_i32 = arith.constant 100 : i32
    %5 = vector.broadcast %c0_i32 : i32 to vector<8x128xi32>
    %6 = arith.maxsi %5, %4 : vector<8x128xi32>
    %7 = vector.broadcast %c100_i32 : i32 to vector<8x128xi32>
    %8 = arith.minsi %7, %6 : vector<8x128xi32>
    %9 = tpu.iota {dimensions = array<i32: 2>} : vector<8x128x128xi32>
    %10 = vector.shape_cast %8 : vector<8x128xi32> to vector<8x128x1xi32>
    %11 = vector.broadcast %10 : vector<8x128x1xi32> to vector<8x128x128xi32>
    %12 = arith.cmpi eq, %11, %9 : vector<8x128x128xi32>
    %c0_1 = arith.constant 0 : index
    %c0_2 = arith.constant 0 : index
    %13 = vector.load %arg1[%c0_1, %c0_2] : memref<1x128xf32, #tpu.memory_space<vmem>>, vector<1x128xf32>
    %14 = vector.shape_cast %13 : vector<1x128xf32> to vector<128xf32>
    %15 = vector.shape_cast %14 : vector<128xf32> to vector<1x1x128xf32>
    %cst_3 = arith.constant 0.000000e+00 : f32
    %16 = vector.shape_cast %15 : vector<1x1x128xf32> to vector<1x1x128xf32>
    %17 = vector.broadcast %16 : vector<1x1x128xf32> to vector<8x128x128xf32>
    %18 = vector.broadcast %cst_3 : f32 to vector<8x128x128xf32>
    %19 = arith.select %12, %17, %18 : vector<8x128x128xi1>, vector<8x128x128xf32>
    %cst_4 = arith.constant dense<0.000000e+00> : vector<8x128xf32>
    %20 = vector.multi_reduction <add>, %19, %cst_4 [2] : vector<8x128x128xf32> to vector<8x128xf32>
    %c0_5 = arith.constant 0 : index
    %c0_6 = arith.constant 0 : index
    %21 = vector.load %arg3[%c0_5, %c0_6] : memref<8x128xf32, #tpu.memory_space<vmem>>, vector<8x128xf32>
    tpu.vector_store %arg3[%c0_5, %c0_6], %20 {strides = array<i32>} : memref<8x128xf32, #tpu.memory_space<vmem>>, vector<8x128xf32>,
    return
  }
  func.func @transform_0(%arg0: i32) -> (i32, i32) {
    %c0_i32 = arith.constant 0 : i32
    %c0_i32_0 = arith.constant 0 : i32
    %c0_i32_1 = arith.constant 0 : i32
    return %c0_i32, %c0_i32_0 : i32, i32
  }
  func.func @transform_1(%arg0: i32) -> (i32, i32) {
    %c0_i32 = arith.constant 0 : i32
    %c0_i32_0 = arith.constant 0 : i32
    return %arg0, %c0_i32 : i32, i32
  }
  func.func @transform_2(%arg0: i32) -> (i32, i32) {
    %c0_i32 = arith.constant 0 : i32
    %c0_i32_0 = arith.constant 0 : i32
    return %arg0, %c0_i32 : i32, i32
  }
}

</mosaic_0001>

<bundles_post_ra>
// kernel: tpu_custom_call.1
= control target key start
LH: loop header
LB: loop body
LE: loop exit
PB: predicated region body
PF: predicated region fallthrough
CT: control target
= control target key end

     0   :  { %7 = vsyncpa [#allocation3], 0  ;;  %s711_s0 = inlined_call_operand.hbm [shape: f32[1,128], index: 0, kind: input, shape index: {}]   ;;  %s712_s1 = inlined_call_operand.hbm [shape: f32[16,128], index: 1, kind: input, shape index: {}]   ;;  %s713_s2 = inlined_call_operand.hbm [shape: f32[16,128], index: 2, kind: output, shape index: {}]  }
   0x1   :  { %8 = vsyncpa [#allocation6], 0 }
   0x2   :  { %10 = vsyncpa [#allocation6 + $0x1], 0 }
   0x3   :  { %11 = vsyncpa [#allocation4], 0 }
   0x4   :  { %13 = vsyncpa [#allocation4 + $0x1], 0  ;;  %s510_s9 = smov 0   ;;  %s512_s10 = smov 0  }
   0x5   :  { %s514_s11 = smov 0   ;;  %s516_s12 = smov 0  }
   0x6 LB: > { %s531_s13 = sadd.s32 4294967295, %s490_s12   ;;  %s286_s14 = sadd.s32 4294967294, %s490_s12   ;;  %s490_s12 = sphi %s516_s12, %s737_s12   ;;  %s486_s11 = sphi %s514_s11, %s736_s11   ;;  %s482_s10 = sphi %s512_s10, %s735_s10   ;;  %s478_s9 = sphi %s510_s9, %s734_s9  }
   0x7   : > { %p60_p0 = scmp.ne.s32.totalorder %s482_s10, %s478_s9  ;;  %p714_p1 = scmp.eq.s32.totalorder %s531_s13, 0 }
   0x8   : > { %p90_p3 = scmp.eq.s32.totalorder %s286_s14, 1  ;;  %p287_p5 = scmp.ge.s32.totalorder %s490_s12, 1 }
   0x9   : > { %p540_p4 = por %p714_p1, %p60_p0  ;;  %p97_p7 = scmp.lt.s32.totalorder %s490_s12, 3 }
   0xa   : > { %p545_p6 = por %p90_p3, %p60_p0  ;;  %s492_s18 = smov [#allocation2]  }
   0xb   : > { %s717_s15 = scalar_select %p540_p4, 1, 0 }
   0xc   : > { %s718_s16 = scalar_select %p545_p6, 1, 0 }
   0xd   : > { %p550_p8 = pnand %p287_p5, %p97_p7  ;;  %s110_s19 = sshll.u32 %s492_s18, 4  ;;  %s111_s19 = int_to_ptr.vmem [resolvable:$true] %s110_s19 }
   0xe   : > { %s558_s20 = sadd.s32 1, %s490_s12   ;;  %s47_s24 = sadd.s32 1, %s486_s11 }
   0xf   : > { %s719_s17 = scalar_select %p550_p8, 1, 0 }
  0x10   : > { %p312_p10 = pneg %p550_p8  ;;  %s44_s22 = ssub.s32 %s490_s12, %s558_s20 }
  0x11   : > { %p568_p12 = scmp.eq.s32.totalorder %s44_s22, 0  ;;  %s362_s27 = scalar_lea.hbm %s711_s0, 16 }
  0x12   : > { %p562_p11 = pnand %p312_p10, %p714_p1  ;;  %p363_p0 = scmp.ne.s32.totalorder %s711_s0, %s362_s27 }
  0x13   : > { %s721_s23 = scalar_select %p568_p12, 1, 0 }
  0x14   : > { %p364_p3 = pneg %p562_p11  ;;  %p369_p10 = scmp.lt.u32.totalorder %s362_s27, %s711_s0 }
  0x16   : > { %p365_p5 = pnand %p364_p3, %p363_p0 }
  0x18   : > { %p366_p7 = pneg %p365_p5 }
  0x1a   : > { %p371_p9 = pnand %p369_p10, %p366_p7 }
  0x1c   : > { %374 = shalt.err (!%p371_p9)
}
  0x1d   : > { %s375_s4 = scalar_lea.vmem %s111_s19, 16  ;;  %s382_s5 = scalar_lea.vmem %s111_s19, 32 }
  0x1e   : > { %p376_p1 = scmp.ne.s32.totalorder %s111_s19, %s375_s4  ;;  %p383_p6 = scmp.lt.s32.totalorder %s111_s19, %s111_s19 }
  0x1f   : > { %p384_p4 = scmp.lt.s32.totalorder %s382_s5, %s375_s4 }
  0x20   : > { %p378_p2 = pnand %p376_p1, %p364_p3 }
  0x21   : > { %p385_p8 = por %p384_p4, %p383_p6 }
  0x22   : > { %p379_p13 = pneg %p378_p2 }
  0x24   : > { %p386_p12 = pnand %p385_p8, %p379_p13 }
  0x26   : > { %389 = shalt.err (!%p386_p12)
}
  0x27   : > { %315 = dma.hbm_to_vmem [thread:$0]  (!%p562_p11), %s711_s0, 16, %s111_s19, [#allocation3]  }
  0x28   : > { %p722_p1 = scmp.ne.s32.totalorder %s721_s23, 0  ;;  %p55_p2 = scmp.eq.s32.totalorder %s490_s12, 0 }
  0x29   : > { %p723_p4 = scmp.ne.s32.totalorder %s486_s11, %s482_s10  ;;  %p724_p6 = scmp.eq.s32.totalorder %s531_s13, 1 }
  0x2a   : > { %s594_s8 = scalar_select %p722_p1, %s486_s11, %s47_s24  }
  0x2b   : > { %p602_p8 = por %p724_p6, %p723_p4  ;;  %p325_p9 = scmp.lt.s32.totalorder %s490_s12, 2 }
  0x2c   : > { %s121_s18 = sand.u32 1, %s486_s11   ;;  %p726_p12 = pmov %p723_p4 }
  0x2d   : > { %s290_s21 = sshll.u32 %s121_s18, 3  ;;  %s291_s22 = sshll.u32 %s490_s12, 7 }
  0x2e   : > { %p56_p13 = por %p55_p2, %p726_p12  ;;  %s615_s19 = scalar_lea.hbm %s712_s1, %s291_s22 }
  0x2f   : > { %s125_s23 = scalar_lea.vmem [#allocation5], %s290_s21  ;;  %s122_s28 = scalar_lea.sflag [#allocation6], %s121_s18 }
  0x30   : > { %s132_s24 = sshll.u32 %s125_s23, 4  ;;  %p617_p11 = pnand %p325_p9, %p56_p13  ;;  %s621_s24 = int_to_ptr.vmem [resolvable:$true] %s132_s24 }
  0x31   : > { %s390_s29 = scalar_lea.hbm %s615_s19, 128  ;;  %s395_s4 = scalar_lea.hbm %s712_s1, 256 }
  0x32   : > { %p391_p0 = scmp.ne.s32.totalorder %s615_s19, %s390_s29  ;;  %p392_p3 = pneg %p617_p11 }
  0x33   : > { %p396_p10 = scmp.lt.u32.totalorder %s615_s19, %s712_s1  ;;  %p397_p1 = scmp.lt.u32.totalorder %s395_s4, %s390_s29 }
  0x34   : > { %p393_p5 = pnand %p392_p3, %p391_p0  ;;  %p399_p4 = scmp.lt.u32.totalorder %s390_s29, %s615_s19 }
  0x35   : > { %p398_p2 = por %p397_p1, %p396_p10 }
  0x36   : > { %p394_p7 = pneg %p393_p5 }
  0x37   : > { %p400_p6 = por %p399_p4, %p398_p2 }
  0x39   : > { %p401_p9 = pnand %p400_p6, %p394_p7 }
  0x3b   : > { %404 = shalt.err (!%p401_p9)
}
  0x3c   : > { %s405_s7 = scalar_lea.vmem %s621_s24, 128  ;;  %s493_s18 = smov [#allocation5]  }
  0x3d   : > { %p406_p12 = scmp.ne.s32.totalorder %s621_s24, %s405_s7  ;;  %s410_s21 = sshll.u32 %s493_s18, 4  ;;  %s411_s21 = int_to_ptr.vmem [resolvable:$false] %s410_s21 }
  0x3e   : > { %s412_s22 = scalar_lea.vmem %s411_s21, 256  ;;  %p413_p5 = scmp.lt.s32.totalorder %s621_s24, %s411_s21 }
  0x3f   : > { %p408_p13 = pnand %p406_p12, %p392_p3  ;;  %p414_p10 = scmp.lt.s32.totalorder %s412_s22, %s405_s7 }
  0x41   : > { %p409_p0 = pneg %p408_p13  ;;  %p415_p1 = por %p414_p10, %p413_p5 }
  0x43   : > { %p416_p2 = pnand %p415_p1, %p409_p0 }
  0x45   : > { %419 = shalt.err (!%p416_p2)
}
  0x46   : > { %319 = dma.hbm_to_vmem [thread:$0]  (!%p617_p11), %s615_s19, 128, %s621_s24, %s122_s28  }
  0x47   : > { %p728_p7 = scmp.ne.s32.totalorder %s719_s17, 0 }
  0x48   : > { %p729_p3 = scmp.eq.s32.totalorder (!%p728_p7), %s531_s13, 0 }
  0x49   : > { %141 = sbr.rel (%p728_p7) target bundleno = 240 (0xf0), region = 28 }
  0x50   : > { %465 = dma.done.wait (%p729_p3), [#allocation3], 16   ;;  %p730_p4 = pmov %p729_p3 }
  0x51   : > { %s655_s25 = sand.u32 1, %s482_s10   ;;  %p731_p6 = scmp.ne.s32.totalorder %s717_s15, 0 }
  0x52   : > { %467 = vsyncadd (%p730_p4), [#allocation3], 4294967280  ;;  %s294_s26 = sshll.u32 %s655_s25, 3  ;;  %s148_s23 = scalar_lea.sflag [#allocation6], %s655_s25 }
  0x53   : > { %s151_s27 = scalar_lea.vmem [#allocation5], %s294_s26 }
  0x54   : > { %469 = dma.done.wait (%p731_p6), %s148_s23, 128  }
  0x55   : > { %471 = vsyncadd (%p731_p6), %s148_s23, 4294967168  ;;  %v172_v0 = vld [vmem:[%s151_s27] sm:$0xff]  ;;  %v296_v5 = vld [vmem:[#allocation2] ss:$0 sm:$0xff]  ;;  %s171_s17 = scalar_lea.vmem [#allocation7], %s294_s26  ;;  %s298_s24 = sshll.u32 %s531_s13, 7 }
  0x56   : > { %v173_v1 = vmul.f32 100.0, %v172_v0  ;;  %s204_s19 = sshll.u32 %s171_s17, 4  ;;  %s669_s29 = scalar_lea.hbm %s713_s2, %s298_s24  ;;  %s664_s19 = int_to_ptr.vmem [resolvable:$true] %s204_s19 }
  0x57   : > { %s191_s30 = scalar_lea.sflag [#allocation4], %s655_s25  ;;  %s420_s3 = scalar_lea.vmem %s664_s19, 128 }
  0x58   : > { %v303_v2 = vcvt.f32.s32 %v173_v1  ;;  %p421_p11 = scmp.ne.s32.totalorder %s664_s19, %s420_s3  ;;  %s494_s4 = smov [#allocation7]  }
  0x59   : > { %s424_s13 = sshll.u32 %s494_s4, 4  ;;  %s425_s13 = int_to_ptr.vmem [resolvable:$false] %s424_s13 }
  0x5a   : > { %vm175_vm0 = vcmp.gt.s32.totalorder %v303_v2, 0  ;;  %p422_p9 = pnand %p421_p11, %p602_p8  ;;  %s426_s5 = scalar_lea.vmem %s425_s13, 256 }
  0x5b   : > { %v176_v3 = vsel %vm175_vm0, %v303_v2, 0  ;;  %p427_p13 = scmp.lt.s32.totalorder %s664_s19, %s425_s13  ;;  %p428_p0 = scmp.lt.s32.totalorder %s426_s5, %s420_s3 }
  0x5c   : > { %vm177_vm1 = vcmp.lt.s32.totalorder %v176_v3, 100  ;;  %p423_p12 = pneg %p422_p9 }
  0x5d   : > { %v178_v4 = vsel %vm177_vm1, %v176_v3, 100  ;;  %p429_p5 = por %p428_p0, %p427_p13 }
  0x5e   : > { %361 = vset.pattern.permute.xlu0 %v178_v4 }
  0x5f   : > { %p430_p10 = pnand %p429_p5, %p423_p12 }
  0x62   : > { %187 = vperm.xlu0 %361, %v296_v5  }
  0xe1   : > { %v188_v6 = vpop.permute.xlu0 %187 }
  0xe2   : > { %189 = vst [vmem:[%s171_s17] sm:$0xff] %v188_v6 }
  0xe3   : > { %433 = shalt.err (!%p430_p10)
}
  0xe4   : > { %s434_s6 = scalar_lea.hbm %s669_s29, 128  ;;  %s438_s21 = scalar_lea.hbm %s713_s2, 256 }
  0xe5   : > { %p435_p1 = scmp.ne.s32.totalorder %s669_s29, %s434_s6  ;;  %p439_p3 = scmp.lt.u32.totalorder %s669_s29, %s713_s2 }
  0xe6   : > { %p440_p4 = scmp.lt.u32.totalorder %s438_s21, %s434_s6  ;;  %p442_p11 = scmp.lt.u32.totalorder %s434_s6, %s669_s29 }
  0xe7   : > { %p436_p2 = pnand %p435_p1, %p602_p8 }
  0xe8   : > { %p441_p6 = por %p440_p4, %p439_p3 }
  0xe9   : > { %p437_p7 = pneg %p436_p2 }
  0xea   : > { %p443_p9 = por %p442_p11, %p441_p6 }
  0xec   : > { %p444_p12 = pnand %p443_p9, %p437_p7 }
  0xee   : > { %447 = shalt.err (!%p444_p12)
}
  0xef   : > { %310 = dma.vmem_to_hbm [thread:$0]  (%p602_p8), %s664_s19, 128, %s669_s29, %s191_s30  }
  0xf0 PF: > { %s216_s26 = sand.u32 1, %s478_s9   ;;  %p732_p13 = scmp.ne.s32.totalorder %s718_s16, 0 }
  0xf1   : > { %p733_p0 = scmp.ge.s32.totalorder %s490_s12, 2  ;;  %s217_s23 = scalar_lea.sflag [#allocation4], %s216_s26 }
  0xf3   : > { %p321_p5 = pnand %p733_p0, %p732_p13 }
  0xf5   : > { %473 = dma.done.wait (!%p321_p5), %s217_s23, 128  }
  0xf6   : > { %475 = vsyncadd (!%p321_p5), %s217_s23, 4294967168  ;;  %p16_p10 = scmp.ge.s32.totalorder %s558_s20, 4   ;;  %s734_s9 = smov %s482_s10 }
  0xf7   : > { %s735_s10 = smov %s486_s11  ;;  %s736_s11 = smov %s594_s8 }
  0xf8   : > { %s737_s12 = smov %s558_s20  ;;  %18 = sbr.rel (!%p16_p10) target bundleno = 6 (0x6), region = 78 }
  0xff   :  { %222 = vsyncpa [#allocation3], 1 }
 0x100   :  { %224 = vsyncpa [#allocation3 + $0x1], 1 }
 0x101   :  { %225 = vsyncpa [#allocation6], 1 }
 0x102   :  { %227 = vsyncpa [#allocation6 + $0x1], 1 }
 0x103   :  { %228 = vsyncpa [#allocation4], 1 }
 0x104   :  { %230 = vsyncpa [#allocation4 + $0x1], 1 }

// kernel: tpu_custom_call.1
= control target key start
LH: loop header
LB: loop body
LE: loop exit
PB: predicated region body
PF: predicated region fallthrough
CT: control target
= control target key end

     0   :  { %7 = vsyncpa [#allocation3], 0  ;;  %s3623_s0 = inlined_call_operand.hbm [shape: f32[1,128], index: 0, kind: input, shape index: {}]   ;;  %s3624_s1 = inlined_call_operand.hbm [shape: f32[16,128], index: 1, kind: input, shape index: {}]   ;;  %s3625_s2 = inlined_call_operand.hbm [shape: f32[16,128], index: 2, kind: output, shape index: {}]  }
   0x1   :  { %8 = vsyncpa [#allocation6], 0 }
   0x2   :  { %10 = vsyncpa [#allocation6 + $0x1], 0 }
   0x3   :  { %11 = vsyncpa [#allocation4], 0 }
   0x4   :  { %13 = vsyncpa [#allocation4 + $0x1], 0  ;;  %s2362_s9 = smov 0   ;;  %s2364_s10 = smov 0  }
   0x5   :  { %s2366_s11 = smov 0   ;;  %s2368_s12 = smov 0  }
   0x6 LB: > { %s2383_s13 = sadd.s32 4294967295, %s2342_s12   ;;  %s2138_s14 = sadd.s32 4294967294, %s2342_s12   ;;  %s2342_s12 = sphi %s2368_s12, %s3755_s12   ;;  %s2338_s11 = sphi %s2366_s11, %s3754_s11   ;;  %s2334_s10 = sphi %s2364_s10, %s3753_s10   ;;  %s2330_s9 = sphi %s2362_s9, %s3752_s9  }
   0x7   : > { %p60_p0 = scmp.ne.s32.totalorder %s2334_s10, %s2330_s9  ;;  %p3626_p1 = scmp.eq.s32.totalorder %s2383_s13, 0 }
   0x8   : > { %p90_p3 = scmp.eq.s32.totalorder %s2138_s14, 1  ;;  %p2139_p5 = scmp.ge.s32.totalorder %s2342_s12, 1 }
   0x9   : > { %p2392_p4 = por %p3626_p1, %p60_p0  ;;  %p97_p7 = scmp.lt.s32.totalorder %s2342_s12, 3 }
   0xa   : > { %p2397_p6 = por %p90_p3, %p60_p0  ;;  %s2344_s18 = smov [#allocation2]  }
   0xb   : > { %s3640_s15 = scalar_select %p2392_p4, 1, 0 }
   0xc   : > { %s3641_s16 = scalar_select %p2397_p6, 1, 0 }
   0xd   : > { %p2402_p8 = pnand %p2139_p5, %p97_p7  ;;  %s110_s19 = sshll.u32 %s2344_s18, 4  ;;  %s111_s19 = int_to_ptr.vmem [resolvable:$true] %s110_s19 }
   0xe   : > { %s2410_s20 = sadd.s32 1, %s2342_s12   ;;  %s47_s24 = sadd.s32 1, %s2338_s11 }
   0xf   : > { %s3642_s17 = scalar_select %p2402_p8, 1, 0 }
  0x10   : > { %p2164_p10 = pneg %p2402_p8  ;;  %s44_s22 = ssub.s32 %s2342_s12, %s2410_s20 }
  0x11   : > { %p2420_p12 = scmp.eq.s32.totalorder %s44_s22, 0  ;;  %s2214_s27 = scalar_lea.hbm %s3623_s0, 16 }
  0x12   : > { %p2414_p11 = pnand %p2164_p10, %p3626_p1  ;;  %p2215_p0 = scmp.ne.s32.totalorder %s3623_s0, %s2214_s27 }
  0x13   : > { %s3644_s23 = scalar_select %p2420_p12, 1, 0 }
  0x14   : > { %p2216_p3 = pneg %p2414_p11  ;;  %p2221_p10 = scmp.lt.u32.totalorder %s2214_s27, %s3623_s0 }
  0x16   : > { %p2217_p5 = pnand %p2216_p3, %p2215_p0 }
  0x18   : > { %p2218_p7 = pneg %p2217_p5 }
  0x1a   : > { %p2223_p9 = pnand %p2221_p10, %p2218_p7 }
  0x1c   : > { %2226 = shalt.err (!%p2223_p9)
}
  0x1d   : > { %s2227_s4 = scalar_lea.vmem %s111_s19, 16  ;;  %s2234_s5 = scalar_lea.vmem %s111_s19, 32 }
  0x1e   : > { %p2228_p1 = scmp.ne.s32.totalorder %s111_s19, %s2227_s4  ;;  %p2235_p6 = scmp.lt.s32.totalorder %s111_s19, %s111_s19 }
  0x1f   : > { %p2236_p4 = scmp.lt.s32.totalorder %s2234_s5, %s2227_s4 }
  0x20   : > { %p2230_p2 = pnand %p2228_p1, %p2216_p3 }
  0x21   : > { %p2237_p8 = por %p2236_p4, %p2235_p6 }
  0x22   : > { %p2231_p13 = pneg %p2230_p2 }
  0x24   : > { %p2238_p12 = pnand %p2237_p8, %p2231_p13 }
  0x26   : > { %2241 = shalt.err (!%p2238_p12)
}
  0x27   : > { %2167 = dma.hbm_to_vmem [thread:$0]  (!%p2414_p11), %s3623_s0, 16, %s111_s19, [#allocation3]  }
  0x28   : > { %p3645_p1 = scmp.ne.s32.totalorder %s3644_s23, 0  ;;  %p55_p2 = scmp.eq.s32.totalorder %s2342_s12, 0 }
  0x29   : > { %p3646_p4 = scmp.ne.s32.totalorder %s2338_s11, %s2334_s10  ;;  %p3647_p6 = scmp.eq.s32.totalorder %s2383_s13, 1 }
  0x2a   : > { %s2446_s8 = scalar_select %p3645_p1, %s2338_s11, %s47_s24  }
  0x2b   : > { %p2454_p8 = por %p3647_p6, %p3646_p4  ;;  %p2177_p9 = scmp.lt.s32.totalorder %s2342_s12, 2 }
  0x2c   : > { %s121_s18 = sand.u32 1, %s2338_s11   ;;  %p3649_p12 = pmov %p3646_p4 }
  0x2d   : > { %s2142_s21 = sshll.u32 %s121_s18, 3  ;;  %s2143_s22 = sshll.u32 %s2342_s12, 7 }
  0x2e   : > { %p56_p13 = por %p55_p2, %p3649_p12  ;;  %s2467_s19 = scalar_lea.hbm %s3624_s1, %s2143_s22 }
  0x2f   : > { %s125_s23 = scalar_lea.vmem [#allocation5], %s2142_s21  ;;  %s122_s28 = scalar_lea.sflag [#allocation6], %s121_s18 }
  0x30   : > { %s132_s24 = sshll.u32 %s125_s23, 4  ;;  %p2469_p11 = pnand %p2177_p9, %p56_p13  ;;  %s2473_s24 = int_to_ptr.vmem [resolvable:$true] %s132_s24 }
  0x31   : > { %s2242_s29 = scalar_lea.hbm %s2467_s19, 128  ;;  %s2247_s4 = scalar_lea.hbm %s3624_s1, 256 }
  0x32   : > { %p2243_p0 = scmp.ne.s32.totalorder %s2467_s19, %s2242_s29  ;;  %p2244_p3 = pneg %p2469_p11 }
  0x33   : > { %p2248_p10 = scmp.lt.u32.totalorder %s2467_s19, %s3624_s1  ;;  %p2249_p1 = scmp.lt.u32.totalorder %s2247_s4, %s2242_s29 }
  0x34   : > { %p2245_p5 = pnand %p2244_p3, %p2243_p0  ;;  %p2251_p4 = scmp.lt.u32.totalorder %s2242_s29, %s2467_s19 }
  0x35   : > { %p2250_p2 = por %p2249_p1, %p2248_p10 }
  0x36   : > { %p2246_p7 = pneg %p2245_p5 }
  0x37   : > { %p2252_p6 = por %p2251_p4, %p2250_p2 }
  0x39   : > { %p2253_p9 = pnand %p2252_p6, %p2246_p7 }
  0x3b   : > { %2256 = shalt.err (!%p2253_p9)
}
  0x3c   : > { %s2257_s7 = scalar_lea.vmem %s2473_s24, 128  ;;  %s2345_s18 = smov [#allocation5]  }
  0x3d   : > { %p2258_p12 = scmp.ne.s32.totalorder %s2473_s24, %s2257_s7  ;;  %s2262_s21 = sshll.u32 %s2345_s18, 4  ;;  %s2263_s21 = int_to_ptr.vmem [resolvable:$false] %s2262_s21 }
  0x3e   : > { %s2264_s22 = scalar_lea.vmem %s2263_s21, 256  ;;  %p2265_p5 = scmp.lt.s32.totalorder %s2473_s24, %s2263_s21 }
  0x3f   : > { %p2260_p13 = pnand %p2258_p12, %p2244_p3  ;;  %p2266_p10 = scmp.lt.s32.totalorder %s2264_s22, %s2257_s7 }
  0x41   : > { %p2261_p0 = pneg %p2260_p13  ;;  %p2267_p1 = por %p2266_p10, %p2265_p5 }
  0x43   : > { %p2268_p2 = pnand %p2267_p1, %p2261_p0 }
  0x45   : > { %2271 = shalt.err (!%p2268_p2)
}
  0x46   : > { %2171 = dma.hbm_to_vmem [thread:$0]  (!%p2469_p11), %s2467_s19, 128, %s2473_s24, %s122_s28  }
  0x47   : > { %p3651_p7 = scmp.ne.s32.totalorder %s3642_s17, 0 }
  0x49   : > { %141 = sbr.rel (%p3651_p7) target bundleno = 797 (0x31d), region = 28 }
  0x50   : > { %p3652_p3 = scmp.eq.s32.totalorder %s2383_s13, 0 }
  0x52   : > { %2317 = dma.done.wait (%p3652_p3), [#allocation3], 16   ;;  %p3653_p4 = pmov %p3652_p3 }
  0x53   : > { %s2507_s25 = sand.u32 1, %s2334_s10   ;;  %p3654_p11 = scmp.ne.s32.totalorder %s3640_s15, 0 }
  0x54   : > { %2319 = vsyncadd (%p3653_p4), [#allocation3], 4294967280  ;;  %s2146_s26 = sshll.u32 %s2507_s25, 3  ;;  %s148_s23 = scalar_lea.sflag [#allocation6], %s2507_s25 }
  0x55   : > { %s151_s19 = scalar_lea.vmem [#allocation5], %s2146_s26 }
  0x56   : > { %2321 = dma.done.wait (%p3654_p11), %s148_s23, 128  }
  0x57   : > { %2323 = vsyncadd (%p3654_p11), %s148_s23, 4294967168  ;;  %v3629_v0 = vlaneseq  ;;  %v172_v1 = vld [vmem:[%s151_s19] sm:$0xff]  ;;  %s2150_s15 = sshll.u32 %s2383_s13, 7  ;;  %s171_s17 = scalar_lea.vmem [#allocation7], %s2146_s26 }
  0x58   : > { %v173_v2 = vmul.f32 100.0, %v172_v1  ;;  %s2056_s24 = sshll.u32 %s171_s17, 4  ;;  %s3579_s29 = scalar_lea.hbm %s3625_s2, %s2150_s15  ;;  %s3581_s24 = int_to_ptr.vmem [resolvable:$true] %s2056_s24 }
  0x59   : > { %v2518_v3 = vshrl.u32 %v3629_v0, 7  ;;  %s2043_s13 = scalar_lea.sflag [#allocation4], %s2507_s25  ;;  %s2272_s30 = scalar_lea.vmem %s3581_s24, 128 }
  0x5a   : > { %v2155_v4 = vcvt.f32.s32 %v173_v2  ;;  %p2273_p6 = scmp.ne.s32.totalorder %s3581_s24, %s2272_s30  ;;  %s2346_s3 = smov [#allocation7]  }
  0x5b   : > { %3655 = vst [vmem:[#allocation11_spill] sm:$0xff] %v2518_v3  ;;  %v183_v5 = vsub.s32 0, %v2518_v3  ;;  %v250_v9 = vsub.s32 1, %v2518_v3  ;;  %v317_v11 = vsub.s32 2, %v2518_v3  ;;  %v384_v13 = vsub.s32 3, %v2518_v3  ;;  %s2276_s4 = sshll.u32 %s2346_s3, 4  ;;  %s2277_s4 = int_to_ptr.vmem [resolvable:$false] %s2276_s4 }
  0x5c   : > { %vm175_vm0 = vcmp.gt.s32.totalorder %v2155_v4, 0  ;;  %v451_v19 = vsub.s32 4, %v2518_v3  ;;  %v518_v37 = vsub.s32 5, %v2518_v3  ;;  %v585_v55 = vsub.s32 6, %v2518_v3  ;;  %p2274_p9 = pnand %p2273_p6, %p2454_p8  ;;  %s2278_s5 = scalar_lea.vmem %s2277_s4, 256 }
  0x5d   : > { %v176_v6 = vsel %vm175_vm0, %v2155_v4, 0  ;;  %p2279_p13 = scmp.lt.s32.totalorder %s3581_s24, %s2277_s4  ;;  %p2280_p0 = scmp.lt.s32.totalorder %s2278_s5, %s2272_s30 }
  0x5e   : > { %vm177_vm1 = vcmp.lt.s32.totalorder %v176_v6, 100  ;;  %p2275_p12 = pneg %p2274_p9 }
  0x5f   : > { %v2521_v7 = vsel %vm177_vm1, %v176_v6, 100  ;;  %p2281_p5 = por %p2280_p0, %p2279_p13 }
  0x60   : > { %v184_v8 = vrot.slane %v2521_v7, %v183_v5  ;;  %v251_v10 = vrot.slane %v2521_v7, %v250_v9  ;;  %v318_v12 = vrot.slane %v2521_v7, %v317_v11  ;;  %v385_v14 = vrot.slane %v2521_v7, %v384_v13 }
  0x61   : > { %v452_v22 = vrot.slane %v2521_v7, %v451_v19  ;;  %v519_v40 = vrot.slane %v2521_v7, %v518_v37  ;;  %v586_v58 = vrot.slane %v2521_v7, %v585_v55  ;;  %p2282_p10 = pnand %p2281_p5, %p2275_p12 }
  0x62   : > { %194 = vbcast.lane.b32.xlu1 %v184_v8, 272  ;;  %186 = vbcast.lane.b32.xlu0 %v184_v8, 256 }
  0x66   : > { %198 = vbcast.lane.b32.xlu1 %v184_v8, 280  ;;  %190 = vbcast.lane.b32.xlu0 %v184_v8, 264 }
  0x6a   : > { %206 = vbcast.lane.b32.xlu1 %v184_v8, 296  ;;  %202 = vbcast.lane.b32.xlu0 %v184_v8, 288 }
  0x6e   : > { %214 = vbcast.lane.b32.xlu1 %v184_v8, 312  ;;  %210 = vbcast.lane.b32.xlu0 %v184_v8, 304 }
  0x72   : > { %222 = vbcast.lane.b32.xlu1 %v184_v8, 328  ;;  %218 = vbcast.lane.b32.xlu0 %v184_v8, 320 }
  0x76   : > { %230 = vbcast.lane.b32.xlu1 %v184_v8, 344  ;;  %226 = vbcast.lane.b32.xlu0 %v184_v8, 336 }
  0x7a   : > { %238 = vbcast.lane.b32.xlu1 %v184_v8, 360  ;;  %234 = vbcast.lane.b32.xlu0 %v184_v8, 352 }
  0x7e   : > { %246 = vbcast.lane.b32.xlu1 %v184_v8, 376  ;;  %242 = vbcast.lane.b32.xlu0 %v184_v8, 368 }
  0x82   : > { %257 = vbcast.lane.b32.xlu1 %v251_v10, 264  ;;  %253 = vbcast.lane.b32.xlu0 %v251_v10, 256 }
  0x86   : > { %265 = vbcast.lane.b32.xlu1 %v251_v10, 280  ;;  %261 = vbcast.lane.b32.xlu0 %v251_v10, 272 }
  0x8a   : > { %273 = vbcast.lane.b32.xlu1 %v251_v10, 296  ;;  %269 = vbcast.lane.b32.xlu0 %v251_v10, 288 }
  0x8e   : > { %281 = vbcast.lane.b32.xlu1 %v251_v10, 312  ;;  %277 = vbcast.lane.b32.xlu0 %v251_v10, 304 }
  0x92   : > { %289 = vbcast.lane.b32.xlu1 %v251_v10, 328  ;;  %285 = vbcast.lane.b32.xlu0 %v251_v10, 320 }
  0x96   : > { %297 = vbcast.lane.b32.xlu1 %v251_v10, 344  ;;  %293 = vbcast.lane.b32.xlu0 %v251_v10, 336 }
  0x9a   : > { %305 = vbcast.lane.b32.xlu1 %v251_v10, 360  ;;  %301 = vbcast.lane.b32.xlu0 %v251_v10, 352 }
  0x9e   : > { %313 = vbcast.lane.b32.xlu1 %v251_v10, 376  ;;  %309 = vbcast.lane.b32.xlu0 %v251_v10, 368 }
  0xa2   : > { %324 = vbcast.lane.b32.xlu1 %v318_v12, 264  ;;  %320 = vbcast.lane.b32.xlu0 %v318_v12, 256 }
  0xa6   : > { %332 = vbcast.lane.b32.xlu1 %v318_v12, 280  ;;  %328 = vbcast.lane.b32.xlu0 %v318_v12, 272 }
  0xaa   : > { %340 = vbcast.lane.b32.xlu1 %v318_v12, 296  ;;  %336 = vbcast.lane.b32.xlu0 %v318_v12, 288 }
  0xae   : > { %348 = vbcast.lane.b32.xlu1 %v318_v12, 312  ;;  %344 = vbcast.lane.b32.xlu0 %v318_v12, 304 }
  0xb2   : > { %356 = vbcast.lane.b32.xlu1 %v318_v12, 328  ;;  %352 = vbcast.lane.b32.xlu0 %v318_v12, 320 }
  0xb6   : > { %364 = vbcast.lane.b32.xlu1 %v318_v12, 344  ;;  %360 = vbcast.lane.b32.xlu0 %v318_v12, 336 }
  0xba   : > { %372 = vbcast.lane.b32.xlu1 %v318_v12, 360  ;;  %368 = vbcast.lane.b32.xlu0 %v318_v12, 352 }
  0xbe   : > { %380 = vbcast.lane.b32.xlu1 %v318_v12, 376  ;;  %376 = vbcast.lane.b32.xlu0 %v318_v12, 368  ;;  %v652_v12 = vsub.s32 7, %v2518_v3 }
  0xc0   : > { %v653_v19 = vrot.slane %v2521_v7, %v652_v12 }
  0xc2   : > { %391 = vbcast.lane.b32.xlu1 %v385_v14, 264  ;;  %387 = vbcast.lane.b32.xlu0 %v385_v14, 256 }
  0xc6   : > { %399 = vbcast.lane.b32.xlu1 %v385_v14, 280  ;;  %395 = vbcast.lane.b32.xlu0 %v385_v14, 272 }
  0xca   : > { %407 = vbcast.lane.b32.xlu1 %v385_v14, 296  ;;  %403 = vbcast.lane.b32.xlu0 %v385_v14, 288 }
  0xce   : > { %415 = vbcast.lane.b32.xlu1 %v385_v14, 312  ;;  %411 = vbcast.lane.b32.xlu0 %v385_v14, 304 }
  0xd2   : > { %423 = vbcast.lane.b32.xlu1 %v385_v14, 328  ;;  %419 = vbcast.lane.b32.xlu0 %v385_v14, 320 }
  0xd4   : > { %v2530_v15 = vpop.permute.xlu0 %186  ;;  %v2532_v16 = vpop.permute.xlu1 %194 }
  0xd6   : > { %431 = vbcast.lane.b32.xlu1 %v385_v14, 344  ;;  %427 = vbcast.lane.b32.xlu0 %v385_v14, 336 }
  0xd8   : > { %v2534_v17 = vpop.permute.xlu0 %190  ;;  %v2536_v18 = vpop.permute.xlu1 %198 }
  0xda   : > { %439 = vbcast.lane.b32.xlu1 %v385_v14, 360  ;;  %435 = vbcast.lane.b32.xlu0 %v385_v14, 352 }
  0xdc   : > { %v2539_v20 = vpop.permute.xlu0 %202  ;;  %v2541_v21 = vpop.permute.xlu1 %206 }
  0xde   : > { %447 = vbcast.lane.b32.xlu1 %v385_v14, 376  ;;  %443 = vbcast.lane.b32.xlu0 %v385_v14, 368 }
  0xe0   : > { %v2544_v23 = vpop.permute.xlu0 %210  ;;  %v2546_v24 = vpop.permute.xlu1 %214 }
  0xe2   : > { %458 = vbcast.lane.b32.xlu1 %v452_v22, 264  ;;  %454 = vbcast.lane.b32.xlu0 %v452_v22, 256 }
  0xe4   : > { %v2548_v25 = vpop.permute.xlu0 %218  ;;  %v2550_v26 = vpop.permute.xlu1 %222 }
  0xe6   : > { %466 = vbcast.lane.b32.xlu1 %v452_v22, 280  ;;  %462 = vbcast.lane.b32.xlu0 %v452_v22, 272 }
  0xe8   : > { %v2552_v27 = vpop.permute.xlu0 %226  ;;  %v2554_v28 = vpop.permute.xlu1 %230 }
  0xea   : > { %474 = vbcast.lane.b32.xlu1 %v452_v22, 296  ;;  %470 = vbcast.lane.b32.xlu0 %v452_v22, 288 }
  0xec   : > { %v2556_v29 = vpop.permute.xlu0 %234  ;;  %v2558_v30 = vpop.permute.xlu1 %238 }
  0xee   : > { %482 = vbcast.lane.b32.xlu1 %v452_v22, 312  ;;  %478 = vbcast.lane.b32.xlu0 %v452_v22, 304 }
  0xf0   : > { %v2560_v31 = vpop.permute.xlu0 %242  ;;  %v2562_v32 = vpop.permute.xlu1 %246 }
  0xf2   : > { %490 = vbcast.lane.b32.xlu1 %v452_v22, 328  ;;  %486 = vbcast.lane.b32.xlu0 %v452_v22, 320 }
  0xf4   : > { %v2564_v33 = vpop.permute.xlu0 %253  ;;  %v2566_v34 = vpop.permute.xlu1 %257 }
  0xf6   : > { %498 = vbcast.lane.b32.xlu1 %v452_v22, 344  ;;  %494 = vbcast.lane.b32.xlu0 %v452_v22, 336 }
  0xf8   : > { %v2568_v35 = vpop.permute.xlu0 %261  ;;  %v2570_v36 = vpop.permute.xlu1 %265 }
  0xfa   : > { %506 = vbcast.lane.b32.xlu1 %v452_v22, 360  ;;  %502 = vbcast.lane.b32.xlu0 %v452_v22, 352 }
  0xfc   : > { %v2573_v38 = vpop.permute.xlu0 %269  ;;  %v2575_v39 = vpop.permute.xlu1 %273 }
  0xfe   : > { %514 = vbcast.lane.b32.xlu1 %v452_v22, 376  ;;  %510 = vbcast.lane.b32.xlu0 %v452_v22, 368 }
 0x100   : > { %v2578_v41 = vpop.permute.xlu0 %277  ;;  %v2580_v42 = vpop.permute.xlu1 %281 }
 0x102   : > { %525 = vbcast.lane.b32.xlu1 %v519_v40, 264  ;;  %521 = vbcast.lane.b32.xlu0 %v519_v40, 256 }
 0x104   : > { %v2582_v43 = vpop.permute.xlu0 %285  ;;  %v2584_v44 = vpop.permute.xlu1 %289 }
 0x106   : > { %533 = vbcast.lane.b32.xlu1 %v519_v40, 280  ;;  %529 = vbcast.lane.b32.xlu0 %v519_v40, 272 }
 0x108   : > { %v2586_v45 = vpop.permute.xlu0 %293  ;;  %v2588_v46 = vpop.permute.xlu1 %297 }
 0x10a   : > { %541 = vbcast.lane.b32.xlu1 %v519_v40, 296  ;;  %537 = vbcast.lane.b32.xlu0 %v519_v40, 288 }
 0x10c   : > { %v2590_v47 = vpop.permute.xlu0 %301  ;;  %v2592_v48 = vpop.permute.xlu1 %305 }
 0x10e   : > { %549 = vbcast.lane.b32.xlu1 %v519_v40, 312  ;;  %545 = vbcast.lane.b32.xlu0 %v519_v40, 304 }
 0x110   : > { %v2594_v49 = vpop.permute.xlu0 %309  ;;  %v2596_v50 = vpop.permute.xlu1 %313 }
 0x112   : > { %557 = vbcast.lane.b32.xlu1 %v519_v40, 328  ;;  %553 = vbcast.lane.b32.xlu0 %v519_v40, 320 }
 0x114   : > { %v2598_v51 = vpop.permute.xlu0 %320  ;;  %v2600_v52 = vpop.permute.xlu1 %324 }
 0x116   : > { %565 = vbcast.lane.b32.xlu1 %v519_v40, 344  ;;  %561 = vbcast.lane.b32.xlu0 %v519_v40, 336 }
 0x118   : > { %v2602_v53 = vpop.permute.xlu0 %328  ;;  %v2604_v54 = vpop.permute.xlu1 %332 }
 0x11a   : > { %573 = vbcast.lane.b32.xlu1 %v519_v40, 360  ;;  %569 = vbcast.lane.b32.xlu0 %v519_v40, 352 }
 0x11c   : > { %v2607_v56 = vpop.permute.xlu0 %336  ;;  %v2609_v57 = vpop.permute.xlu1 %340 }
 0x11e   : > { %581 = vbcast.lane.b32.xlu1 %v519_v40, 376  ;;  %577 = vbcast.lane.b32.xlu0 %v519_v40, 368 }
 0x120   : > { %v2612_v59 = vpop.permute.xlu0 %344  ;;  %v2614_v60 = vpop.permute.xlu1 %348 }
 0x122   : > { %592 = vbcast.lane.b32.xlu1 %v586_v58, 264  ;;  %588 = vbcast.lane.b32.xlu0 %v586_v58, 256 }
 0x124   : > { %v2616_v61 = vpop.permute.xlu0 %352  ;;  %v2618_v62 = vpop.permute.xlu1 %356 }
 0x126   : > { %600 = vbcast.lane.b32.xlu1 %v586_v58, 280  ;;  %596 = vbcast.lane.b32.xlu0 %v586_v58, 272 }
 0x128   : > { %v2620_v63 = vpop.permute.xlu0 %360  ;;  %v2622_v1 = vpop.permute.xlu1 %364 }
 0x12a   : > { %608 = vbcast.lane.b32.xlu1 %v586_v58, 296  ;;  %604 = vbcast.lane.b32.xlu0 %v586_v58, 288 }
 0x12c   : > { %v2624_v2 = vpop.permute.xlu0 %368  ;;  %v2626_v4 = vpop.permute.xlu1 %372 }
 0x12e   : > { %616 = vbcast.lane.b32.xlu1 %v586_v58, 312  ;;  %612 = vbcast.lane.b32.xlu0 %v586_v58, 304 }
 0x130   : > { %v2628_v5 = vpop.permute.xlu0 %376  ;;  %v2630_v6 = vpop.permute.xlu1 %380 }
 0x132   : > { %624 = vbcast.lane.b32.xlu1 %v586_v58, 328  ;;  %620 = vbcast.lane.b32.xlu0 %v586_v58, 320 }
 0x134   : > { %v2632_v8 = vpop.permute.xlu0 %387  ;;  %v2634_v9 = vpop.permute.xlu1 %391 }
 0x136   : > { %632 = vbcast.lane.b32.xlu1 %v586_v58, 344  ;;  %628 = vbcast.lane.b32.xlu0 %v586_v58, 336 }
 0x138   : > { %v2636_v10 = vpop.permute.xlu0 %395  ;;  %v2638_v11 = vpop.permute.xlu1 %399 }
 0x13a   : > { %640 = vbcast.lane.b32.xlu1 %v586_v58, 360  ;;  %636 = vbcast.lane.b32.xlu0 %v586_v58, 352 }
 0x13c   : > { %v2641_v13 = vpop.permute.xlu0 %403  ;;  %v2643_v14 = vpop.permute.xlu1 %407 }
 0x13d   : > { %3656 = vst [vmem:[#allocation12_spill] sm:$0xff] %v2643_v14  ;;  %v3677_v14 = vlaneseq }
 0x13e   : > { %648 = vbcast.lane.b32.xlu1 %v586_v58, 376  ;;  %644 = vbcast.lane.b32.xlu0 %v586_v58, 368 }
 0x140   : > { %v2646_v22 = vpop.permute.xlu0 %411  ;;  %v2648_v37 = vpop.permute.xlu1 %415 }
 0x141   : > { %3657 = vst [vmem:[#allocation13_spill] sm:$0xff] %v2646_v22  ;;  %3658 = vst [vmem:[#allocation14_spill] sm:$0xff] %v2648_v37 }
 0x142   : > { %659 = vbcast.lane.b32.xlu1 %v653_v19, 264  ;;  %655 = vbcast.lane.b32.xlu0 %v653_v19, 256 }
 0x144   : > { %v2650_v40 = vpop.permute.xlu0 %419  ;;  %v2652_v55 = vpop.permute.xlu1 %423 }
 0x145   : > { %3659 = vst [vmem:[#allocation15_spill] sm:$0xff] %v2650_v40  ;;  %3660 = vst [vmem:[#allocation16_spill] sm:$0xff] %v2652_v55 }
 0x146   : > { %667 = vbcast.lane.b32.xlu1 %v653_v19, 280  ;;  %663 = vbcast.lane.b32.xlu0 %v653_v19, 272 }
 0x148   : > { %v2654_v0 = vpop.permute.xlu0 %427  ;;  %v2656_v3 = vpop.permute.xlu1 %431 }
 0x149   : > { %3661 = vst [vmem:[#allocation17_spill] sm:$0xff] %v2654_v0  ;;  %3662 = vst [vmem:[#allocation18_spill] sm:$0xff] %v2656_v3 }
 0x14a   : > { %675 = vbcast.lane.b32.xlu1 %v653_v19, 296  ;;  %671 = vbcast.lane.b32.xlu0 %v653_v19, 288 }
 0x14c   : > { %v2658_v7 = vpop.permute.xlu0 %435  ;;  %v2660_v58 = vpop.permute.xlu1 %439 }
 0x14d   : > { %3663 = vst [vmem:[#allocation19_spill] sm:$0xff] %v2658_v7  ;;  %3664 = vst [vmem:[#allocation20_spill] sm:$0xff] %v2660_v58 }
 0x14e   : > { %683 = vbcast.lane.b32.xlu1 %v653_v19, 312  ;;  %679 = vbcast.lane.b32.xlu0 %v653_v19, 304 }
 0x150   : > { %v2662_v12 = vpop.permute.xlu0 %443  ;;  %v2664_v37 = vpop.permute.xlu1 %447 }
 0x151   : > { %3665 = vst [vmem:[#allocation21_spill] sm:$0xff] %v2662_v12  ;;  %3666 = vst [vmem:[#allocation22_spill] sm:$0xff] %v2664_v37 }
 0x152   : > { %691 = vbcast.lane.b32.xlu1 %v653_v19, 328  ;;  %687 = vbcast.lane.b32.xlu0 %v653_v19, 320 }
 0x154   : > { %v2666_v55 = vpop.permute.xlu0 %454  ;;  %v2668_v40 = vpop.permute.xlu1 %458 }
 0x155   : > { %3667 = vst [vmem:[#allocation23_spill] sm:$0xff] %v2666_v55  ;;  %3668 = vst [vmem:[#allocation24_spill] sm:$0xff] %v2668_v40 }
 0x156   : > { %699 = vbcast.lane.b32.xlu1 %v653_v19, 344  ;;  %695 = vbcast.lane.b32.xlu0 %v653_v19, 336 }
 0x158   : > { %v2670_v3 = vpop.permute.xlu0 %462  ;;  %v2672_v0 = vpop.permute.xlu1 %466 }
 0x159   : > { %3669 = vst [vmem:[#allocation25_spill] sm:$0xff] %v2670_v3  ;;  %3670 = vst [vmem:[#allocation26_spill] sm:$0xff] %v2672_v0 }
 0x15a   : > { %707 = vbcast.lane.b32.xlu1 %v653_v19, 360  ;;  %703 = vbcast.lane.b32.xlu0 %v653_v19, 352 }
 0x15c   : > { %v2674_v58 = vpop.permute.xlu0 %470  ;;  %v2676_v7 = vpop.permute.xlu1 %474 }
 0x15d   : > { %3671 = vst [vmem:[#allocation27_spill] sm:$0xff] %v2674_v58  ;;  %3672 = vst [vmem:[#allocation28_spill] sm:$0xff] %v2676_v7  ;;  %v2693_v58 = vand.u32 127, %v3677_v14 }
 0x15e   : > { %715 = vbcast.lane.b32.xlu1 %v653_v19, 376  ;;  %711 = vbcast.lane.b32.xlu0 %v653_v19, 368 }
 0x15f   : > { %vm717_vm2 = vcmp.eq.s32.totalorder %v2530_v15, %v2693_v58  ;;  %vm719_vm3 = vcmp.eq.s32.totalorder %v2532_v16, %v2693_v58  ;;  %vm718_vm4 = vcmp.eq.s32.totalorder %v2534_v17, %v2693_v58  ;;  %vm720_vm5 = vcmp.eq.s32.totalorder %v2536_v18, %v2693_v58 }
 0x160   : > { %v2678_v37 = vpop.permute.xlu0 %478  ;;  %v2680_v12 = vpop.permute.xlu1 %482  ;;  %vm721_vm6 = vcmp.eq.s32.totalorder %v2539_v20, %v2693_v58  ;;  %vm722_vm7 = vcmp.eq.s32.totalorder %v2541_v21, %v2693_v58  ;;  %vm723_vm8 = vcmp.eq.s32.totalorder %v2544_v23, %v2693_v58  ;;  %vm724_vm9 = vcmp.eq.s32.totalorder %v2546_v24, %v2693_v58 }
 0x161   : > { %3673 = vst [vmem:[#allocation29_spill] sm:$0xff] %v2678_v37  ;;  %v2699_v37 = vld [vmem:[#allocation2] ss:$0 sm:$0xff]  ;;  %vm725_vm10 = vcmp.eq.s32.totalorder %v2548_v25, %v2693_v58  ;;  %vm726_vm11 = vcmp.eq.s32.totalorder %v2550_v26, %v2693_v58  ;;  %vm727_vm12 = vcmp.eq.s32.totalorder %v2552_v27, %v2693_v58  ;;  %vm728_vm13 = vcmp.eq.s32.totalorder %v2554_v28, %v2693_v58 }
 0x162   : > { %v854_v14 = vsel %vm719_vm3, %v2699_v37, 0.0  ;;  %v853_v15 = vsel %vm718_vm4, %v2699_v37, 0.0  ;;  %v856_v16 = vsel %vm721_vm6, %v2699_v37, 0.0  ;;  %v857_v20 = vsel %vm722_vm7, %v2699_v37, 0.0 }
 0x163   : > { %v859_v21 = vsel %vm724_vm9, %v2699_v37, 0.0  ;;  %v862_v25 = vsel %vm727_vm12, %v2699_v37, 0.0  ;;  %vm729_vm14 = vcmp.eq.s32.totalorder %v2556_v29, %v2693_v58  ;;  %v863_v27 = vsel %vm728_vm13, %v2699_v37, 0.0 }
 0x164   : > { %v2682_v55 = vpop.permute.xlu0 %486  ;;  %v2684_v40 = vpop.permute.xlu1 %490  ;;  %vm730_vm15 = vcmp.eq.s32.totalorder %v2558_v30, %v2693_v58  ;;  %vm731_vm0 = vcmp.eq.s32.totalorder %v2560_v31, %v2693_v58  ;;  %vm732_vm1 = vcmp.eq.s32.totalorder %v2562_v32, %v2693_v58  ;;  %vm734_vm3 = vcmp.eq.s32.totalorder %v2566_v34, %v2693_v58 }
 0x165   : > { %3674 = vst [vmem:[#allocation30_spill] sm:$0xff] %v2682_v55  ;;  %3675 = vst [vmem:[#allocation31_spill] sm:$0xff] %v2684_v40  ;;  %v865_v28 = vsel %vm730_vm15, %v2699_v37, 0.0  ;;  %vm735_vm4 = vcmp.eq.s32.totalorder %v2568_v35, %v2693_v58  ;;  %vm737_vm6 = vcmp.eq.s32.totalorder %v2573_v38, %v2693_v58  ;;  %vm738_vm7 = vcmp.eq.s32.totalorder %v2575_v39, %v2693_v58 }
 0x166   : > { %vm740_vm9 = vcmp.eq.s32.totalorder %v2580_v42, %v2693_v58  ;;  %vm743_vm12 = vcmp.eq.s32.totalorder %v2586_v45, %v2693_v58  ;;  %vm744_vm13 = vcmp.eq.s32.totalorder %v2588_v46, %v2693_v58  ;;  %vm746_vm15 = vcmp.eq.s32.totalorder %v2592_v48, %v2693_v58 }
 0x168   : > { %v2686_v22 = vpop.permute.xlu0 %494  ;;  %v2688_v3 = vpop.permute.xlu1 %498 }
 0x169   : > { %3676 = vst [vmem:[#allocation32_spill] sm:$0xff] %v2688_v3  ;;  %v852_v3 = vsel %vm717_vm2, %v2699_v37, 0.0  ;;  %vm733_vm2 = vcmp.eq.s32.totalorder %v2564_v33, %v2693_v58  ;;  %v869_v33 = vsel %vm734_vm3, %v2699_v37, 0.0  ;;  %vm750_vm3 = vcmp.eq.s32.totalorder %v2600_v52, %v2693_v58 }
 0x16a   : > { %v868_v31 = vsel %vm733_vm2, %v2699_v37, 0.0  ;;  %vm749_vm2 = vcmp.eq.s32.totalorder %v2598_v51, %v2693_v58 }
 0x16c   : > { %v2690_v0 = vpop.permute.xlu0 %502  ;;  %v2695_v7 = vpop.permute.xlu1 %506 }
 0x170   : > { %v2697_v19 = vpop.permute.xlu0 %510  ;;  %v2703_v55 = vpop.permute.xlu1 %514 }
 0x171   : > { %3678 = vst [vmem:[#allocation33_spill] sm:$0xff] %v2697_v19 }
 0x174   : > { %v2705_v40 = vpop.permute.xlu0 %521  ;;  %v2715_v19 = vpop.permute.xlu1 %525 }
 0x175   : > { %3679 = vst [vmem:[#allocation34_spill] sm:$0xff] %v2705_v40 }
 0x178   : > { %v2720_v40 = vpop.permute.xlu0 %529  ;;  %v2728_v17 = vpop.permute.xlu1 %533 }
 0x17c   : > { %v2730_v18 = vpop.permute.xlu0 %537  ;;  %v2741_v23 = vpop.permute.xlu1 %541 }
 0x17d   : > { %980 = vadd.xlane.f32.xlu0 %v852_v3  ;;  %v855_v3 = vsel %vm720_vm5, %v2699_v37, 0.0  ;;  %vm736_vm5 = vcmp.eq.s32.totalorder %v2570_v36, %v2693_v58 }
 0x17e   : > { %v871_v34 = vsel %vm736_vm5, %v2699_v37, 0.0  ;;  %vm752_vm5 = vcmp.eq.s32.totalorder %v2604_v54, %v2693_v58 }
 0x180   : > { %v2746_v24 = vpop.permute.xlu0 %545  ;;  %v2754_v26 = vpop.permute.xlu1 %549 }
 0x181   : > { %984 = vadd.xlane.f32.xlu0 %v854_v14  ;;  %v858_v14 = vsel %vm723_vm8, %v2699_v37, 0.0  ;;  %vm739_vm8 = vcmp.eq.s32.totalorder %v2578_v41, %v2693_v58  ;;  %v875_v41 = vsel %vm740_vm9, %v2699_v37, 0.0  ;;  %vm756_vm9 = vcmp.eq.s32.totalorder %v2614_v60, %v2693_v58 }
 0x182   : > { %982 = vadd.xlane.f32.xlu1 %v853_v15  ;;  %v860_v15 = vsel %vm725_vm10, %v2699_v37, 0.0  ;;  %v874_v38 = vsel %vm739_vm8, %v2699_v37, 0.0  ;;  %vm741_vm10 = vcmp.eq.s32.totalorder %v2582_v43, %v2693_v58  ;;  %vm755_vm8 = vcmp.eq.s32.totalorder %v2612_v59, %v2693_v58 }
 0x184   : > { %v2767_v29 = vpop.permute.xlu1 %557 }
 0x185   : > { %986 = vadd.xlane.f32.xlu0 %v855_v3  ;;  %v861_v3 = vsel %vm726_vm11, %v2699_v37, 0.0  ;;  %vm742_vm11 = vcmp.eq.s32.totalorder %v2584_v44, %v2693_v58 }
 0x186   : > { %988 = vadd.xlane.f32.xlu1 %v856_v16  ;;  %v2756_v16 = vpop.permute.xlu0 %553  ;;  %v877_v42 = vsel %vm742_vm11, %v2699_v37, 0.0  ;;  %vm758_vm11 = vcmp.eq.s32.totalorder %v2618_v62, %v2693_v58 }
 0x188   : > { %v2780_v32 = vpop.permute.xlu1 %565 }
 0x189   : > { %990 = vadd.xlane.f32.xlu0 %v857_v20  ;;  %v864_v20 = vsel %vm729_vm14, %v2699_v37, 0.0  ;;  %vm745_vm14 = vcmp.eq.s32.totalorder %v2590_v47, %v2693_v58  ;;  %v881_v47 = vsel %vm746_vm15, %v2699_v37, 0.0  ;;  %vm762_vm15 = vcmp.eq.s32.totalorder %v2626_v4, %v2693_v58 }
 0x18a   : > { %992 = vadd.xlane.f32.xlu1 %v858_v14  ;;  %v866_v14 = vsel %vm731_vm0, %v2699_v37, 0.0  ;;  %v2772_v30 = vpop.permute.xlu0 %561  ;;  %v880_v45 = vsel %vm745_vm14, %v2699_v37, 0.0  ;;  %vm747_vm0 = vcmp.eq.s32.totalorder %v2594_v49, %v2693_v58  ;;  %vm761_vm14 = vcmp.eq.s32.totalorder %v2624_v2, %v2693_v58 }
 0x18c   : > { %v2793_v35 = vpop.permute.xlu1 %573 }
 0x18d   : > { %994 = vadd.xlane.f32.xlu0 %v859_v21  ;;  %v867_v21 = vsel %vm732_vm1, %v2699_v37, 0.0  ;;  %vm748_vm1 = vcmp.eq.s32.totalorder %v2596_v50, %v2693_v58 }
 0x18e   : > { %996 = vadd.xlane.f32.xlu1 %v860_v15  ;;  %v2782_v15 = vpop.permute.xlu0 %569  ;;  %v883_v48 = vsel %vm748_vm1, %v2699_v37, 0.0  ;;  %vm764_vm1 = vcmp.eq.s32.totalorder %v2630_v6, %v2693_v58 }
 0x190   : > { %v2806_v39 = vpop.permute.xlu1 %581 }
 0x191   : > { %998 = vadd.xlane.f32.xlu0 %v861_v3  ;;  %v870_v3 = vsel %vm735_vm4, %v2699_v37, 0.0  ;;  %3681 = vst [vmem:[#allocation36_spill] sm:$0xff] %v2806_v39  ;;  %vm751_vm4 = vcmp.eq.s32.totalorder %v2602_v53, %v2693_v58  ;;  %v887_v53 = vsel %vm752_vm5, %v2699_v37, 0.0  ;;  %vm768_vm5 = vcmp.eq.s32.totalorder %v2638_v11, %v2693_v58  ;;  %v3686_v11 = vld [vmem:[#allocation13_spill] sm:$0xff]  ;;  %v3711_v39 = vld [vmem:[#allocation32_spill] sm:$0xff] }
 0x192   : > { %1000 = vadd.xlane.f32.xlu1 %v862_v25  ;;  %v872_v25 = vsel %vm737_vm6, %v2699_v37, 0.0  ;;  %v2798_v36 = vpop.permute.xlu0 %577  ;;  %v886_v51 = vsel %vm751_vm4, %v2699_v37, 0.0  ;;  %vm753_vm6 = vcmp.eq.s32.totalorder %v2607_v56, %v2693_v58  ;;  %vm767_vm4 = vcmp.eq.s32.totalorder %v2636_v10, %v2693_v58  ;;  %v3685_v10 = vld [vmem:[#allocation12_spill] sm:$0xff] }
 0x193   : > { %3680 = vst [vmem:[#allocation35_spill] sm:$0xff] %v2798_v36 }
 0x194   : > { %v2819_v43 = vpop.permute.xlu1 %592 }
 0x195   : > { %1002 = vadd.xlane.f32.xlu0 %v863_v27  ;;  %v873_v27 = vsel %vm738_vm7, %v2699_v37, 0.0  ;;  %vm754_vm7 = vcmp.eq.s32.totalorder %v2609_v57, %v2693_v58 }
 0x196   : > { %1004 = vadd.xlane.f32.xlu1 %v864_v20  ;;  %v2808_v20 = vpop.permute.xlu0 %588  ;;  %v889_v54 = vsel %vm754_vm7, %v2699_v37, 0.0  ;;  %vm770_vm7 = vcmp.eq.s32.totalorder %v3685_v10, %v2693_v58 }
 0x198   : > { %v2832_v46 = vpop.permute.xlu1 %600 }
 0x199   : > { %1006 = vadd.xlane.f32.xlu0 %v865_v28  ;;  %v876_v28 = vsel %vm741_vm10, %v2699_v37, 0.0  ;;  %vm757_vm10 = vcmp.eq.s32.totalorder %v2616_v61, %v2693_v58  ;;  %v893_v61 = vsel %vm758_vm11, %v2699_v37, 0.0 }
 0x19a   : > { %1008 = vadd.xlane.f32.xlu1 %v866_v14  ;;  %v878_v14 = vsel %vm743_vm12, %v2699_v37, 0.0  ;;  %v2824_v44 = vpop.permute.xlu0 %596  ;;  %v892_v59 = vsel %vm757_vm10, %v2699_v37, 0.0  ;;  %vm759_vm12 = vcmp.eq.s32.totalorder %v2620_v63, %v2693_v58 }
 0x19c   : > { %v2845_v49 = vpop.permute.xlu1 %608 }
 0x19d   : > { %1010 = vadd.xlane.f32.xlu0 %v867_v21  ;;  %v879_v21 = vsel %vm744_vm13, %v2699_v37, 0.0  ;;  %vm760_vm13 = vcmp.eq.s32.totalorder %v2622_v1, %v2693_v58 }
 0x19e   : > { %1012 = vadd.xlane.f32.xlu1 %v868_v31  ;;  %v2834_v31 = vpop.permute.xlu0 %604  ;;  %v895_v62 = vsel %vm760_vm13, %v2699_v37, 0.0 }
 0x1a0   : > { %v2858_v52 = vpop.permute.xlu1 %616 }
 0x1a1   : > { %1014 = vadd.xlane.f32.xlu0 %v869_v33  ;;  %v882_v33 = vsel %vm747_vm0, %v2699_v37, 0.0  ;;  %vm763_vm0 = vcmp.eq.s32.totalorder %v2628_v5, %v2693_v58  ;;  %v899_v5 = vsel %vm764_vm1, %v2699_v37, 0.0 }
 0x1a2   : > { %1016 = vadd.xlane.f32.xlu1 %v870_v3  ;;  %v884_v3 = vsel %vm749_vm2, %v2699_v37, 0.0  ;;  %v2850_v50 = vpop.permute.xlu0 %612  ;;  %v898_v2 = vsel %vm763_vm0, %v2699_v37, 0.0  ;;  %vm765_vm2 = vcmp.eq.s32.totalorder %v2632_v8, %v2693_v58 }
 0x1a4   : > { %v2871_v56 = vpop.permute.xlu1 %624 }
 0x1a5   : > { %1018 = vadd.xlane.f32.xlu0 %v871_v34  ;;  %v885_v34 = vsel %vm750_vm3, %v2699_v37, 0.0  ;;  %vm766_vm3 = vcmp.eq.s32.totalorder %v2634_v9, %v2693_v58 }
 0x1a6   : > { %1020 = vadd.xlane.f32.xlu1 %v872_v25  ;;  %v2860_v25 = vpop.permute.xlu0 %620  ;;  %v901_v6 = vsel %vm766_vm3, %v2699_v37, 0.0 }
 0x1a8   : > { %v2884_v60 = vpop.permute.xlu1 %632 }
 0x1a9   : > { %1022 = vadd.xlane.f32.xlu0 %v873_v27  ;;  %v888_v27 = vsel %vm753_vm6, %v2699_v37, 0.0  ;;  %vm769_vm6 = vcmp.eq.s32.totalorder %v2641_v13, %v2693_v58  ;;  %v905_v13 = vsel %vm770_vm7, %v2699_v37, 0.0 }
 0x1aa   : > { %1024 = vadd.xlane.f32.xlu1 %v874_v38  ;;  %v890_v38 = vsel %vm755_vm8, %v2699_v37, 0.0  ;;  %v2876_v57 = vpop.permute.xlu0 %628  ;;  %vm771_vm8 = vcmp.eq.s32.totalorder %v3686_v11, %v2693_v58 }
 0x1ac   : > { %v2897_v63 = vpop.permute.xlu1 %640 }
 0x1ad   : > { %1026 = vadd.xlane.f32.xlu0 %v875_v41  ;;  %v891_v41 = vsel %vm756_vm9, %v2699_v37, 0.0  ;;  %3682 = vst [vmem:[#allocation37_spill] sm:$0xff] %v2897_v63 }
 0x1ae   : > { %1028 = vadd.xlane.f32.xlu1 %v876_v28  ;;  %v2886_v28 = vpop.permute.xlu0 %636 }
 0x1b0   : > { %v2910_v4 = vpop.permute.xlu1 %648 }
 0x1b1   : > { %1030 = vadd.xlane.f32.xlu0 %v877_v42  ;;  %v894_v42 = vsel %vm759_vm12, %v2699_v37, 0.0  ;;  %3684 = vst [vmem:[#allocation39_spill] sm:$0xff] %v2910_v4 }
 0x1b2   : > { %1032 = vadd.xlane.f32.xlu1 %v878_v14  ;;  %v896_v14 = vsel %vm761_vm14, %v2699_v37, 0.0  ;;  %v2902_v1 = vpop.permute.xlu0 %644 }
 0x1b3   : > { %3683 = vst [vmem:[#allocation38_spill] sm:$0xff] %v2902_v1 }
 0x1b4   : > { %v2923_v8 = vpop.permute.xlu1 %659 }
 0x1b5   : > { %1034 = vadd.xlane.f32.xlu0 %v879_v21  ;;  %v897_v21 = vsel %vm762_vm15, %v2699_v37, 0.0 }
 0x1b6   : > { %1036 = vadd.xlane.f32.xlu1 %v880_v45  ;;  %v2912_v45 = vpop.permute.xlu0 %655 }
 0x1b9   : > { %1038 = vadd.xlane.f32.xlu0 %v881_v47  ;;  %v900_v47 = vsel %vm765_vm2, %v2699_v37, 0.0 }
 0x1ba   : > { %1040 = vadd.xlane.f32.xlu1 %v882_v33  ;;  %v902_v33 = vsel %vm767_vm4, %v2699_v37, 0.0  ;;  %v2928_v9 = vpop.permute.xlu0 %663 }
 0x1bd   : > { %1042 = vadd.xlane.f32.xlu0 %v883_v48  ;;  %v903_v48 = vsel %vm768_vm5, %v2699_v37, 0.0 }
 0x1be   : > { %1044 = vadd.xlane.f32.xlu1 %v884_v3  ;;  %v904_v3 = vsel %vm769_vm6, %v2699_v37, 0.0 }
 0x1c1   : > { %1046 = vadd.xlane.f32.xlu0 %v885_v34  ;;  %v2936_v34 = vpop.permute.xlu1 %667 }
 0x1c2   : > { %1048 = vadd.xlane.f32.xlu1 %v886_v51  ;;  %v2938_v51 = vpop.permute.xlu0 %671 }
 0x1c5   : > { %1050 = vadd.xlane.f32.xlu0 %v887_v53  ;;  %v3687_v53 = vld [vmem:[#allocation14_spill] sm:$0xff] }
 0x1c6   : > { %1052 = vadd.xlane.f32.xlu1 %v888_v27  ;;  %vm772_vm9 = vcmp.eq.s32.totalorder %v3687_v53, %v2693_v58  ;;  %v906_v27 = vsel %vm771_vm8, %v2699_v37, 0.0 }
 0x1c9   : > { %1054 = vadd.xlane.f32.xlu0 %v889_v54  ;;  %v3688_v54 = vld [vmem:[#allocation15_spill] sm:$0xff] }
 0x1ca   : > { %1056 = vadd.xlane.f32.xlu1 %v890_v38  ;;  %vm773_vm10 = vcmp.eq.s32.totalorder %v3688_v54, %v2693_v58  ;;  %v907_v38 = vsel %vm772_vm9, %v2699_v37, 0.0  ;;  %v3696_v54 = vld [vmem:[#allocation23_spill] sm:$0xff]  ;;  %vm788_vm9 = vcmp.eq.s32.totalorder %v2680_v12, %v2693_v58 }
 0x1cb   : > { %vm781_vm2 = vcmp.eq.s32.totalorder %v3696_v54, %v2693_v58  ;;  %v3705_v54 = vld [vmem:[#allocation29_spill] sm:$0xff] }
 0x1cc   : > { %vm787_vm8 = vcmp.eq.s32.totalorder %v3705_v54, %v2693_v58  ;;  %v923_v54 = vsel %vm788_vm9, %v2699_v37, 0.0  ;;  %vm1415_vm9 = vcmask 523712  }
 0x1cd   : > { %1058 = vadd.xlane.f32.xlu0 %v891_v41  ;;  %v3689_v41 = vld [vmem:[#allocation16_spill] sm:$0xff] }
 0x1ce   : > { %1060 = vadd.xlane.f32.xlu1 %v892_v59  ;;  %vm774_vm11 = vcmp.eq.s32.totalorder %v3689_v41, %v2693_v58  ;;  %v2949_v59 = vpop.permute.xlu1 %675 }
 0x1d1   : > { %1062 = vadd.xlane.f32.xlu0 %v893_v61  ;;  %v908_v61 = vsel %vm773_vm10, %v2699_v37, 0.0 }
 0x1d2   : > { %1064 = vadd.xlane.f32.xlu1 %v894_v42  ;;  %v3690_v42 = vld [vmem:[#allocation17_spill] sm:$0xff] }
 0x1d3   : > { %vm775_vm12 = vcmp.eq.s32.totalorder %v3690_v42, %v2693_v58  ;;  %v916_v42 = vsel %vm781_vm2, %v2699_v37, 0.0  ;;  %vm1394_vm2 = vcmask 326912  }
 0x1d5   : > { %1066 = vadd.xlane.f32.xlu0 %v895_v62  ;;  %v2954_v62 = vpop.permute.xlu0 %679 }
 0x1d6   : > { %1068 = vadd.xlane.f32.xlu1 %v896_v14  ;;  %v909_v14 = vsel %vm774_vm11, %v2699_v37, 0.0 }
 0x1d9   : > { %1070 = vadd.xlane.f32.xlu0 %v897_v21  ;;  %v3691_v21 = vld [vmem:[#allocation18_spill] sm:$0xff] }
 0x1da   : > { %1072 = vadd.xlane.f32.xlu1 %v898_v2  ;;  %vm776_vm13 = vcmp.eq.s32.totalorder %v3691_v21, %v2693_v58  ;;  %v910_v2 = vsel %vm775_vm12, %v2699_v37, 0.0  ;;  %vm791_vm12 = vcmp.eq.s32.totalorder %v2686_v22, %v2693_v58  ;;  %v1410_v22 = vadd.s32 4294967240, %v2693_v58 }
 0x1dd   : > { %1074 = vadd.xlane.f32.xlu0 %v899_v5  ;;  %v3692_v5 = vld [vmem:[#allocation19_spill] sm:$0xff] }
 0x1de   : > { %1076 = vadd.xlane.f32.xlu1 %v900_v47  ;;  %vm777_vm14 = vcmp.eq.s32.totalorder %v3692_v5, %v2693_v58  ;;  %v2962_v47 = vpop.permute.xlu1 %683 }
 0x1df   : > { %v912_v10 = vsel %vm777_vm14, %v2699_v37, 0.0  ;;  %vm1380_vm14 = vcmask 195712  }
 0x1e1   : > { %1078 = vadd.xlane.f32.xlu0 %v901_v6  ;;  %v2964_v6 = vpop.permute.xlu0 %687 }
 0x1e2   : > { %1080 = vadd.xlane.f32.xlu1 %v902_v33  ;;  %v911_v33 = vsel %vm776_vm13, %v2699_v37, 0.0  ;;  %v2975_v53 = vpop.permute.xlu1 %691  ;;  %vm1373_vm13 = vcmask 130112  }
 0x1e5   : > { %1082 = vadd.xlane.f32.xlu0 %v903_v48  ;;  %v3693_v48 = vld [vmem:[#allocation20_spill] sm:$0xff] }
 0x1e6   : > { %1084 = vadd.xlane.f32.xlu1 %v904_v3  ;;  %vm778_vm15 = vcmp.eq.s32.totalorder %v3693_v48, %v2693_v58  ;;  %v3694_v3 = vld [vmem:[#allocation21_spill] sm:$0xff]  ;;  %v2988_v21 = vpop.permute.xlu1 %699 }
 0x1e7   : > { %vm779_vm0 = vcmp.eq.s32.totalorder %v3694_v3, %v2693_v58  ;;  %v913_v11 = vsel %vm778_vm15, %v2699_v37, 0.0  ;;  %3699 = vst [vmem:[#allocation12_spill] sm:$0xff] %v2988_v21  ;;  %vm792_vm15 = vcmp.eq.s32.totalorder %v3711_v39, %v2693_v58 }
 0x1e9   : > { %1086 = vadd.xlane.f32.xlu0 %v905_v13  ;;  %v3695_v13 = vld [vmem:[#allocation22_spill] sm:$0xff] }
 0x1ea   : > { %1088 = vadd.xlane.f32.xlu1 %v906_v27  ;;  %vm780_vm1 = vcmp.eq.s32.totalorder %v3695_v13, %v2693_v58  ;;  %v914_v27 = vsel %vm779_vm0, %v2699_v37, 0.0  ;;  %v3001_v13 = vpop.permute.xlu1 %707  ;;  %vm793_vm0 = vcmp.eq.s32.totalorder %v2690_v0, %v2693_v58 }
 0x1eb   : > { %v915_v41 = vsel %vm780_vm1, %v2699_v37, 0.0  ;;  %3704 = vst [vmem:[#allocation14_spill] sm:$0xff] %v3001_v13  ;;  %vm1387_vm1 = vcmask 261312  }
 0x1ed   : > { %1090 = vadd.xlane.f32.xlu0 %v907_v38  ;;  %v2980_v38 = vpop.permute.xlu0 %695 }
 0x1ee   : > { %1092 = vadd.xlane.f32.xlu1 %v908_v61  ;;  %v3697_v61 = vld [vmem:[#allocation24_spill] sm:$0xff] }
 0x1ef   : > { %vm782_vm3 = vcmp.eq.s32.totalorder %v3697_v61, %v2693_v58 }
 0x1f0   : > { %v917_v5 = vsel %vm782_vm3, %v2699_v37, 0.0  ;;  %vm794_vm3 = vcmp.eq.s32.totalorder %v2695_v7, %v2693_v58 }
 0x1f1   : > { %1094 = vadd.xlane.f32.xlu0 %v909_v14  ;;  %v3698_v14 = vld [vmem:[#allocation25_spill] sm:$0xff] }
 0x1f2   : > { %1096 = vadd.xlane.f32.xlu1 %v910_v2  ;;  %vm783_vm4 = vcmp.eq.s32.totalorder %v3698_v14, %v2693_v58  ;;  %v2990_v2 = vpop.permute.xlu0 %703  ;;  %v922_v14 = vsel %vm787_vm8, %v2699_v37, 0.0 }
 0x1f3   : > { %3700 = vst [vmem:[#allocation13_spill] sm:$0xff] %v2990_v2  ;;  %v918_v48 = vsel %vm783_vm4, %v2699_v37, 0.0 }
 0x1f5   : > { %1098 = vadd.xlane.f32.xlu0 %v911_v33  ;;  %v3701_v33 = vld [vmem:[#allocation26_spill] sm:$0xff] }
 0x1f6   : > { %1100 = vadd.xlane.f32.xlu1 %v912_v10  ;;  %vm784_vm5 = vcmp.eq.s32.totalorder %v3701_v33, %v2693_v58  ;;  %v3702_v10 = vld [vmem:[#allocation27_spill] sm:$0xff]  ;;  %v3707_v33 = vld [vmem:[#allocation30_spill] sm:$0xff] }
 0x1f7   : > { %vm785_vm6 = vcmp.eq.s32.totalorder %v3702_v10, %v2693_v58  ;;  %v919_v3 = vsel %vm784_vm5, %v2699_v37, 0.0  ;;  %vm789_vm10 = vcmp.eq.s32.totalorder %v3707_v33, %v2693_v58  ;;  %v3708_v10 = vld [vmem:[#allocation31_spill] sm:$0xff]  ;;  %v1389_v33 = vadd.s32 4294967264, %v2693_v58 }
 0x1f8   : > { %vm790_vm11 = vcmp.eq.s32.totalorder %v3708_v10, %v2693_v58  ;;  %vm1401_vm5 = vcmask 392512  }
 0x1f9   : > { %1102 = vadd.xlane.f32.xlu0 %v913_v11  ;;  %v3703_v11 = vld [vmem:[#allocation28_spill] sm:$0xff] }
 0x1fa   : > { %1104 = vadd.xlane.f32.xlu1 %v914_v27  ;;  %vm786_vm7 = vcmp.eq.s32.totalorder %v3703_v11, %v2693_v58  ;;  %v920_v27 = vsel %vm785_vm6, %v2699_v37, 0.0  ;;  %v1382_v11 = vadd.s32 4294967272, %v2693_v58  ;;  %vm1408_vm6 = vcmask 458112  }
 0x1fb   : > { %v921_v61 = vsel %vm786_vm7, %v2699_v37, 0.0  ;;  %vm796_vm7 = vcmp.eq.s32.totalorder %v2703_v55, %v2693_v58 }
 0x1fd   : > { %1106 = vadd.xlane.f32.xlu0 %v915_v41  ;;  %v3006_v41 = vpop.permute.xlu0 %711 }
 0x1fe   : > { %1108 = vadd.xlane.f32.xlu1 %v916_v42  ;;  %3706 = vst [vmem:[#allocation15_spill] sm:$0xff] %v3006_v41  ;;  %v1368_v42 = vadd.s32 4294967288, %v2693_v58  ;;  %v925_v41 = vsel %vm790_vm11, %v2699_v37, 0.0  ;;  %vm798_vm11 = vcmp.eq.s32.totalorder %v2715_v19, %v2693_v58 }
 0x201   : > { %1110 = vadd.xlane.f32.xlu0 %v917_v5  ;;  %v1375_v5 = vadd.s32 4294967280, %v2693_v58 }
 0x202   : > { %1112 = vadd.xlane.f32.xlu1 %v918_v48 }
 0x205   : > { %1114 = vadd.xlane.f32.xlu0 %v919_v3  ;;  %v3018_v3 = vpop.permute.xlu1 %715 }
 0x206   : > { %1116 = vadd.xlane.f32.xlu1 %v920_v27  ;;  %3709 = vst [vmem:[#allocation16_spill] sm:$0xff] %v3018_v3  ;;  %v3710_v27 = vld [vmem:[#allocation11_spill] sm:$0xff] }
 0x207   : > { %v3023_v12 = vsub.s32 %v2693_v58, %v3710_v27  ;;  %v3032_v10 = vsub.s32 %v1375_v5, %v3710_v27  ;;  %v3044_v1 = vsub.s32 %v1389_v33, %v3710_v27 }
 0x209   : > { %1118 = vadd.xlane.f32.xlu0 %v921_v61  ;;  %v3027_v61 = vsub.s32 %v1368_v42, %v3710_v27  ;;  %v3038_v42 = vsub.s32 %v1382_v11, %v3710_v27  ;;  %v926_v11 = vsel %vm791_vm12, %v2699_v37, 0.0  ;;  %vm799_vm12 = vcmp.eq.s32.totalorder %v2720_v40, %v2693_v58 }
 0x20a   : > { %1120 = vadd.xlane.f32.xlu1 %v922_v14  ;;  %v981_v48 = vpop.xlane.xlu0 %980  ;;  %v924_v14 = vsel %vm789_vm10, %v2699_v37, 0.0  ;;  %vm3638_vm10 = vcmask 589312  }
 0x20b   : > { %v1367_v13 = vrot.slane %v981_v48, %v3023_v12 }
 0x20d   : > { %1122 = vadd.xlane.f32.xlu0 %v923_v54  ;;  %v1396_v54 = vadd.s32 4294967256, %v2693_v58 }
 0x20e   : > { %1124 = vadd.xlane.f32.xlu1 %v924_v14  ;;  %v985_v3 = vpop.xlane.xlu0 %984  ;;  %v1403_v14 = vadd.s32 4294967248, %v2693_v58 }
 0x20f   : > { %v983_v4 = vpop.xlane.xlu1 %982  ;;  %v1379_v2 = vrot.slane %v985_v3, %v3032_v10 }
 0x210   : > { %v1372_v5 = vrot.slane %v983_v4, %v3027_v61 }
 0x211   : > { %1126 = vadd.xlane.f32.xlu0 %v925_v41  ;;  %v3060_v41 = vsub.s32 %v1396_v54, %v3710_v27 }
 0x212   : > { %v1374_v4 = vsel %vm1373_vm13, %v1372_v5, %v1367_v13  ;;  %1128 = vadd.xlane.f32.xlu1 %v926_v11  ;;  %v987_v48 = vpop.xlane.xlu0 %986  ;;  %v927_v13 = vsel %vm792_vm15, %v2699_v37, 0.0  ;;  %v3069_v5 = vsub.s32 %v1403_v14, %v3710_v27  ;;  %v928_v11 = vsel %vm793_vm0, %v2699_v37, 0.0 }
 0x213   : > { %v1381_v33 = vsel %vm1380_vm14, %v1379_v2, %v1374_v4  ;;  %v1386_v63 = vrot.slane %v987_v48, %v3038_v42  ;;  %v989_v3 = vpop.xlane.xlu1 %988  ;;  %v1417_v2 = vadd.s32 4294967232, %v2693_v58  ;;  %v3712_v4 = vld [vmem:[#allocation33_spill] sm:$0xff]  ;;  %vm3639_vm15 = vcmask 654912  }
 0x214   : > { %v1393_v36 = vrot.slane %v989_v3, %v3044_v1  ;;  %vm795_vm4 = vcmp.eq.s32.totalorder %v3712_v4, %v2693_v58  ;;  %v929_v3 = vsel %vm794_vm3, %v2699_v37, 0.0  ;;  %vm3635_vm0 = vcmask 720512  }
 0x215   : > { %v1388_v54 = vsel %vm1387_vm1, %v1386_v63, %v1381_v33  ;;  %1130 = vadd.xlane.f32.xlu0 %v927_v13  ;;  %v3084_v63 = vsub.s32 %v1410_v22, %v3710_v27  ;;  %v1424_v33 = vadd.s32 4294967224, %v2693_v58  ;;  %v3090_v13 = vsub.s32 %v1417_v2, %v3710_v27 }
 0x216   : > { %v1395_v39 = vsel %vm1394_vm2, %v1393_v36, %v1388_v54  ;;  %1132 = vadd.xlane.f32.xlu1 %v928_v11  ;;  %v991_v14 = vpop.xlane.xlu0 %990  ;;  %v1431_v36 = vadd.s32 4294967216, %v2693_v58  ;;  %v930_v22 = vsel %vm795_vm4, %v2699_v37, 0.0  ;;  %v3713_v11 = vld [vmem:[#allocation34_spill] sm:$0xff]  ;;  %vm813_vm3 = vcmp.eq.s32.totalorder %v2808_v20, %v2693_v58 }
 0x217   : > { %v1400_v48 = vrot.slane %v991_v14, %v3060_v41  ;;  %v993_v7 = vpop.xlane.xlu1 %992  ;;  %vm797_vm8 = vcmp.eq.s32.totalorder %v3713_v11, %v2693_v58  ;;  %vm814_vm4 = vcmp.eq.s32.totalorder %v2819_v43, %v2693_v58 }
 0x218   : > { %v1407_v0 = vrot.slane %v993_v7, %v3069_v5  ;;  %v3111_v21 = vsub.s32 %v1431_v36, %v3710_v27 }
 0x219   : > { %v1402_v54 = vsel %vm1401_vm5, %v1400_v48, %v1395_v39  ;;  %1134 = vadd.xlane.f32.xlu0 %v929_v3  ;;  %v3105_v39 = vsub.s32 %v1424_v33, %v3710_v27  ;;  %v1438_v48 = vadd.s32 4294967208, %v2693_v58  ;;  %v931_v3 = vsel %vm796_vm7, %v2699_v37, 0.0 }
 0x21a   : > { %v1409_v14 = vsel %vm1408_vm6, %v1407_v0, %v1402_v54  ;;  %1136 = vadd.xlane.f32.xlu1 %v930_v22  ;;  %v995_v2 = vpop.xlane.xlu0 %994  ;;  %v1445_v0 = vadd.s32 4294967200, %v2693_v58  ;;  %v932_v33 = vsel %vm797_vm8, %v2699_v37, 0.0  ;;  %vm3637_vm7 = vcmask 786112  }
 0x21b   : > { %v1414_v7 = vrot.slane %v995_v2, %v3084_v63  ;;  %v997_v55 = vpop.xlane.xlu1 %996  ;;  %vm3636_vm8 = vcmask 851712  }
 0x21c   : > { %v1421_v4 = vrot.slane %v997_v55, %v3090_v13  ;;  %v933_v55 = vsel %vm798_vm11, %v2699_v37, 0.0  ;;  %vm800_vm11 = vcmp.eq.s32.totalorder %v2728_v17, %v2693_v58 }
 0x21d   : > { %v1416_v54 = vsel %vm1415_vm9, %v1414_v7, %v1409_v14  ;;  %1138 = vadd.xlane.f32.xlu0 %v931_v3  ;;  %v3126_v14 = vsub.s32 %v1438_v48, %v3710_v27  ;;  %v1452_v7 = vadd.s32 4294967192, %v2693_v58  ;;  %v3132_v3 = vsub.s32 %v1445_v0, %v3710_v27 }
 0x21e   : > { %v1423_v22 = vsel %vm3638_vm10, %v1421_v4, %v1416_v54  ;;  %1140 = vadd.xlane.f32.xlu1 %v932_v33  ;;  %v999_v36 = vpop.xlane.xlu0 %998  ;;  %v1459_v4 = vadd.s32 4294967184, %v2693_v58  ;;  %v934_v48 = vsel %vm799_vm12, %v2699_v37, 0.0  ;;  %vm815_vm12 = vcmp.eq.s32.totalorder %v2824_v44, %v2693_v58 }
 0x21f   : > { %v1428_v2 = vrot.slane %v999_v36, %v3105_v39  ;;  %v1001_v19 = vpop.xlane.xlu1 %1000  ;;  %v935_v43 = vsel %vm800_vm11, %v2699_v37, 0.0  ;;  %vm801_vm11 = vcmp.eq.s32.totalorder %v2730_v18, %v2693_v58 }
 0x220   : > { %v1435_v11 = vrot.slane %v1001_v19, %v3111_v21  ;;  %v948_v19 = vsel %vm813_vm3, %v2699_v37, 0.0  ;;  %vm1457_vm3 = vcmask 917312   ;;  %v936_v18 = vsel %vm801_vm11, %v2699_v37, 0.0 }
 0x221   : > { %v1430_v54 = vsel %vm3639_vm15, %v1428_v2, %v1423_v22  ;;  %1142 = vadd.xlane.f32.xlu0 %v933_v55  ;;  %v3147_v22 = vsub.s32 %v1452_v7, %v3710_v27  ;;  %v1466_v2 = vadd.s32 4294967176, %v2693_v58  ;;  %v3153_v55 = vsub.s32 %v1459_v4, %v3710_v27 }
 0x222   : > { %v1437_v33 = vsel %vm3635_vm0, %v1435_v11, %v1430_v54  ;;  %1144 = vadd.xlane.f32.xlu1 %v934_v48  ;;  %v1003_v0 = vpop.xlane.xlu0 %1002  ;;  %v949_v7 = vsel %vm814_vm4, %v2699_v37, 0.0  ;;  %vm1464_vm0 = vcmask 982912   ;;  %vm829_vm4 = vcmp.eq.s32.totalorder %v2912_v45, %v2693_v58 }
 0x223   : > { %v1442_v36 = vrot.slane %v1003_v0, %v3126_v14  ;;  %v1005_v20 = vpop.xlane.xlu1 %1004  ;;  %vm817_vm11 = vcmp.eq.s32.totalorder %v2834_v31, %v2693_v58 }
 0x224   : > { %v1449_v40 = vrot.slane %v1005_v20, %v3132_v3 }
 0x225   : > { %v1444_v11 = vsel %vm3637_vm7, %v1442_v36, %v1437_v33  ;;  %1172 = vadd.xlane.f32.xlu0 %v948_v19  ;;  %v3167_v33 = vsub.s32 %v1466_v2, %v3710_v27  ;;  %v950_v36 = vsel %vm815_vm12, %v2699_v37, 0.0  ;;  %vm1471_vm7 = vcmask 1048512  }
 0x226   : > { %v1451_v54 = vsel %vm3636_vm8, %v1449_v40, %v1444_v11  ;;  %1174 = vadd.xlane.f32.xlu1 %v949_v7  ;;  %v1007_v4 = vpop.xlane.xlu0 %1006  ;;  %vm830_vm8 = vcmp.eq.s32.totalorder %v2923_v8, %v2693_v58  ;;  %v964_v19 = vsel %vm829_vm4, %v2699_v37, 0.0  ;;  %vm816_vm12 = vcmp.eq.s32.totalorder %v2832_v46, %v2693_v58 }
 0x227   : > { %v1456_v48 = vrot.slane %v1007_v4, %v3147_v22  ;;  %v1009_v17 = vpop.xlane.xlu1 %1008  ;;  %v965_v11 = vsel %vm830_vm8, %v2699_v37, 0.0  ;;  %vm831_vm4 = vcmp.eq.s32.totalorder %v2928_v9, %v2693_v58  ;;  %vm802_vm8 = vcmp.eq.s32.totalorder %v2741_v23, %v2693_v58 }
 0x228   : > { %v1463_v0 = vrot.slane %v1009_v17, %v3153_v55 }
 0x229   : > { %v1458_v44 = vsel %vm1457_vm3, %v1456_v48, %v1451_v54  ;;  %1146 = vadd.xlane.f32.xlu0 %v935_v43 }
 0x22a   : > { %v1465_v20 = vsel %vm1464_vm0, %v1463_v0, %v1458_v44  ;;  %1176 = vadd.xlane.f32.xlu1 %v950_v36  ;;  %v1011_v27 = vpop.xlane.xlu0 %1010  ;;  %v951_v0 = vsel %vm816_vm12, %v2699_v37, 0.0  ;;  %vm832_vm12 = vcmp.eq.s32.totalorder %v2936_v34, %v2693_v58 }
 0x22b   : > { %v1470_v2 = vrot.slane %v1011_v27, %v3167_v33  ;;  %v1013_v40 = vpop.xlane.xlu1 %1012  ;;  %v966_v27 = vsel %vm831_vm4, %v2699_v37, 0.0  ;;  %vm803_vm4 = vcmp.eq.s32.totalorder %v2746_v24, %v2693_v58 }
 0x22c   : > { %v1476_v7 = vrot.slane %v1013_v40, %v3023_v12 }
 0x22d   : > { %v3183_v45 = vsel %vm1471_vm7, %v1470_v2, %v1465_v20  ;;  %1204 = vadd.xlane.f32.xlu0 %v964_v19  ;;  %v937_v2 = vsel %vm802_vm8, %v2699_v37, 0.0  ;;  %vm818_vm8 = vcmp.eq.s32.totalorder %v2845_v49, %v2693_v58 }
 0x22e   : > { %1206 = vadd.xlane.f32.xlu1 %v965_v11  ;;  %v1015_v8 = vpop.xlane.xlu0 %1014 }
 0x22f   : > { %v1480_v54 = vrot.slane %v1015_v8, %v3027_v61  ;;  %v1017_v4 = vpop.xlane.xlu1 %1016 }
 0x230   : > { %v1485_v48 = vrot.slane %v1017_v4, %v3032_v10 }
 0x231   : > { %v1481_v17 = vsel %vm1373_vm13, %v1480_v54, %v1476_v7  ;;  %1148 = vadd.xlane.f32.xlu0 %v936_v18  ;;  %v952_v7 = vsel %vm817_vm11, %v2699_v37, 0.0  ;;  %v967_v54 = vsel %vm832_vm12, %v2699_v37, 0.0  ;;  %vm833_vm11 = vcmp.eq.s32.totalorder %v2938_v51, %v2693_v58 }
 0x232   : > { %v1486_v46 = vsel %vm1380_vm14, %v1485_v48, %v1481_v17  ;;  %1178 = vadd.xlane.f32.xlu1 %v951_v0  ;;  %v1019_v43 = vpop.xlane.xlu0 %1018  ;;  %v938_v0 = vsel %vm803_vm4, %v2699_v37, 0.0  ;;  %vm804_vm12 = vcmp.eq.s32.totalorder %v2754_v26, %v2693_v58  ;;  %vm819_vm4 = vcmp.eq.s32.totalorder %v2850_v50, %v2693_v58 }
 0x233   : > { %v1490_v44 = vrot.slane %v1019_v43, %v3038_v42  ;;  %v1021_v36 = vpop.xlane.xlu1 %1020 }
 0x234   : > { %v1495_v20 = vrot.slane %v1021_v36, %v3044_v1 }
 0x235   : > { %v1491_v9 = vsel %vm1387_vm1, %v1490_v44, %v1486_v46  ;;  %1208 = vadd.xlane.f32.xlu0 %v966_v27  ;;  %v953_v46 = vsel %vm818_vm8, %v2699_v37, 0.0  ;;  %v968_v27 = vsel %vm833_vm11, %v2699_v37, 0.0  ;;  %vm834_vm8 = vcmp.eq.s32.totalorder %v2949_v59, %v2693_v58 }
 0x236   : > { %v1496_v23 = vsel %vm1394_vm2, %v1495_v20, %v1491_v9  ;;  %1150 = vadd.xlane.f32.xlu1 %v937_v2  ;;  %v1023_v40 = vpop.xlane.xlu0 %1022  ;;  %v939_v9 = vsel %vm804_vm12, %v2699_v37, 0.0  ;;  %vm805_vm11 = vcmp.eq.s32.totalorder %v2756_v16, %v2693_v58  ;;  %vm3716_vm12 = vcmask 851712  }
 0x237   : > { %v1500_v19 = vrot.slane %v1023_v40, %v3060_v41  ;;  %v1025_v11 = vpop.xlane.xlu1 %1024 }
 0x238   : > { %v1505_v8 = vrot.slane %v1025_v11, %v3069_v5  ;;  %v954_v11 = vsel %vm819_vm4, %v2699_v37, 0.0  ;;  %vm806_vm4 = vcmp.eq.s32.totalorder %v2767_v29, %v2693_v58 }
 0x239   : > { %v1501_v31 = vsel %vm1401_vm5, %v1500_v19, %v1496_v23  ;;  %1180 = vadd.xlane.f32.xlu0 %v952_v7 }
 0x23a   : > { %v1506_v34 = vsel %vm1408_vm6, %v1505_v8, %v1501_v31  ;;  %1210 = vadd.xlane.f32.xlu1 %v967_v54  ;;  %v1027_v4 = vpop.xlane.xlu0 %1026  ;;  %v969_v8 = vsel %vm834_vm8, %v2699_v37, 0.0  ;;  %vm2026_vm8 = vcmask 1041409  }
 0x23b   : > { %v1510_v48 = vrot.slane %v1027_v4, %v3084_v63  ;;  %v1029_v18 = vpop.xlane.xlu1 %1028  ;;  %v940_v4 = vsel %vm805_vm11, %v2699_v37, 0.0  ;;  %vm821_vm11 = vcmp.eq.s32.totalorder %v2860_v25, %v2693_v58 }
 0x23c   : > { %v1515_v17 = vrot.slane %v1029_v18, %v3090_v13 }
 0x23d   : > { %v1511_v24 = vsel %vm1415_vm9, %v1510_v48, %v1506_v34  ;;  %1152 = vadd.xlane.f32.xlu0 %v938_v0 }
 0x23e   : > { %v1516_v49 = vsel %vm3638_vm10, %v1515_v17, %v1511_v24  ;;  %1182 = vadd.xlane.f32.xlu1 %v953_v46  ;;  %v1031_v43 = vpop.xlane.xlu0 %1030  ;;  %vm3714_vm10 = vcmask 720512   ;;  %v941_v46 = vsel %vm806_vm4, %v2699_v37, 0.0  ;;  %vm837_vm4 = vcmp.eq.s32.totalorder %v2964_v6, %v2693_v58 }
 0x23f   : > { %v1520_v44 = vrot.slane %v1031_v43, %v3105_v39  ;;  %v1033_v36 = vpop.xlane.xlu1 %1032 }
 0x240   : > { %v1525_v20 = vrot.slane %v1033_v36, %v3111_v21 }
 0x241   : > { %v1521_v51 = vsel %vm3639_vm15, %v1520_v44, %v1516_v49  ;;  %1212 = vadd.xlane.f32.xlu0 %v968_v27  ;;  %vm3715_vm15 = vcmask 786112  }
 0x242   : > { %v1526_v26 = vsel %vm3714_vm10, %v1525_v20, %v1521_v51  ;;  %1154 = vadd.xlane.f32.xlu1 %v939_v9  ;;  %v1035_v2 = vpop.xlane.xlu0 %1034  ;;  %vm820_vm10 = vcmp.eq.s32.totalorder %v2858_v52, %v2693_v58  ;;  %v3273_v20 = vld [vmem:[#allocation2] ss:$0 sm:$0xff] }
 0x243   : > { %v1530_v23 = vrot.slane %v1035_v2, %v3126_v14  ;;  %v1037_v40 = vpop.xlane.xlu1 %1036  ;;  %v955_v48 = vsel %vm820_vm10, %v2699_v37, 0.0  ;;  %vm836_vm10 = vcmp.eq.s32.totalorder %v2962_v47, %v2693_v58  ;;  %v956_v27 = vsel %vm821_vm11, %v3273_v20, 0.0 }
 0x244   : > { %v1535_v19 = vrot.slane %v1037_v40, %v3132_v3  ;;  %v971_v47 = vsel %vm836_vm10, %v3273_v20, 0.0  ;;  %vm823_vm11 = vcmp.eq.s32.totalorder %v2876_v57, %v2693_v58  ;;  %vm838_vm10 = vcmp.eq.s32.totalorder %v2975_v53, %v2693_v58 }
 0x245   : > { %v1531_v50 = vsel %vm3715_vm15, %v1530_v23, %v1526_v26  ;;  %1184 = vadd.xlane.f32.xlu0 %v954_v11  ;;  %vm835_vm15 = vcmp.eq.s32.totalorder %v2954_v62, %v2693_v58 }
 0x246   : > { %v1536_v59 = vsel %vm3716_vm12, %v1535_v19, %v1531_v50  ;;  %1214 = vadd.xlane.f32.xlu1 %v969_v8  ;;  %v1039_v7 = vpop.xlane.xlu0 %1038  ;;  %v970_v24 = vsel %vm835_vm15, %v2699_v37, 0.0  ;;  %vm807_vm12 = vcmp.eq.s32.totalorder %v2772_v30, %v2693_v58  ;;  %vm822_vm15 = vcmp.eq.s32.totalorder %v2871_v56, %v2693_v58 }
 0x247   : > { %v1540_v31 = vrot.slane %v1039_v7, %v3147_v22  ;;  %v1041_v54 = vpop.xlane.xlu1 %1040  ;;  %v942_v23 = vsel %vm807_vm12, %v3273_v20, 0.0  ;;  %v957_v40 = vsel %vm822_vm15, %v3273_v20, 0.0  ;;  %vm809_vm12 = vcmp.eq.s32.totalorder %v2782_v15, %v2693_v58 }
 0x248   : > { %v1545_v34 = vrot.slane %v1041_v54, %v3153_v55  ;;  %vm824_vm15 = vcmp.eq.s32.totalorder %v2884_v60, %v2693_v58 }
 0x249   : > { %v1541_v16 = vsel %vm1457_vm3, %v1540_v31, %v1536_v59  ;;  %1156 = vadd.xlane.f32.xlu0 %v940_v4  ;;  %v972_v59 = vsel %vm837_vm4, %v3273_v20, 0.0  ;;  %vm3717_vm4 = vcmask 589312  }
 0x24a   : > { %v1546_v52 = vsel %vm1464_vm0, %v1545_v34, %v1541_v16  ;;  %1186 = vadd.xlane.f32.xlu1 %v955_v48  ;;  %v1043_v18 = vpop.xlane.xlu0 %1042  ;;  %v958_v16 = vsel %vm823_vm11, %v3273_v20, 0.0  ;;  %v973_v48 = vsel %vm838_vm10, %v3273_v20, 0.0  ;;  %vm3718_vm11 = vcmask 654912  }
 0x24b   : > { %v1550_v17 = vrot.slane %v1043_v18, %v3167_v33  ;;  %v1045_v0 = vpop.xlane.xlu1 %1044  ;;  %vm810_vm10 = vcmp.eq.s32.totalorder %v2793_v35, %v2693_v58  ;;  %v3721_v35 = vld [vmem:[#allocation12_spill] sm:$0xff] }
 0x24c   : > { %v1555_v43 = vrot.slane %v1045_v0, %v3023_v12 }
 0x24d   : > { %v1551_v62 = vsel %vm1471_vm7, %v1550_v17, %v1546_v52  ;;  %1216 = vadd.xlane.f32.xlu0 %v970_v24  ;;  %v944_v24 = vsel %vm809_vm12, %v3273_v20, 0.0  ;;  %vm825_vm12 = vcmp.eq.s32.totalorder %v2886_v28, %v2693_v58  ;;  %v3723_v28 = vld [vmem:[#allocation35_spill] sm:$0xff] }
 0x24e   : > { %v3268_v29 = vsel %vm2026_vm8, %v1551_v62, %v3183_v45  ;;  %1158 = vadd.xlane.f32.xlu1 %v941_v46  ;;  %v1047_v49 = vpop.xlane.xlu0 %1046  ;;  %vm808_vm8 = vcmp.eq.s32.totalorder %v2780_v32, %v2693_v58  ;;  %v959_v62 = vsel %vm824_vm15, %v3273_v20, 0.0  ;;  %vm840_vm15 = vcmp.eq.s32.totalorder %v3721_v35, %v2693_v58 }
 0x24f   : > { %v1559_v44 = vrot.slane %v1047_v49, %v3027_v61  ;;  %v1049_v36 = vpop.xlane.xlu1 %1048  ;;  %v943_v7 = vsel %vm808_vm8, %v3273_v20, 0.0  ;;  %vm839_vm8 = vcmp.eq.s32.totalorder %v2980_v38, %v2693_v58 }
 0x250   : > { %v1564_v25 = vrot.slane %v1049_v36, %v3032_v10  ;;  %v974_v36 = vsel %vm839_vm8, %v3273_v20, 0.0  ;;  %vm811_vm8 = vcmp.eq.s32.totalorder %v3723_v28, %v2693_v58 }
 0x251   : > { %v1560_v37 = vsel %vm1373_vm13, %v1559_v44, %v1555_v43  ;;  %1188 = vadd.xlane.f32.xlu0 %v956_v27 }
 0x252   : > { %v1565_v45 = vsel %vm1380_vm14, %v1564_v25, %v1560_v37  ;;  %1218 = vadd.xlane.f32.xlu1 %v971_v47  ;;  %v1051_v51 = vpop.xlane.xlu0 %1050  ;;  %v945_v25 = vsel %vm810_vm10, %v3273_v20, 0.0 }
 0x253   : > { %v1569_v9 = vrot.slane %v1051_v51, %v3038_v42  ;;  %v1053_v26 = vpop.xlane.xlu1 %1052 }
 0x254   : > { %v1574_v2 = vrot.slane %v1053_v26, %v3044_v1 }
 0x255   : > { %v1570_v30 = vsel %vm1387_vm1, %v1569_v9, %v1565_v45  ;;  %1160 = vadd.xlane.f32.xlu0 %v942_v23  ;;  %v960_v9 = vsel %vm825_vm12, %v3273_v20, 0.0  ;;  %v3724_v23 = vld [vmem:[#allocation37_spill] sm:$0xff] }
 0x256   : > { %v1575_v56 = vsel %vm1394_vm2, %v1574_v2, %v1570_v30  ;;  %1190 = vadd.xlane.f32.xlu1 %v957_v40  ;;  %v1055_v19 = vpop.xlane.xlu0 %1054  ;;  %v975_v2 = vsel %vm840_vm15, %v3273_v20, 0.0  ;;  %vm826_vm10 = vcmp.eq.s32.totalorder %v3724_v23, %v2693_v58 }
 0x257   : > { %v1579_v11 = vrot.slane %v1055_v19, %v3060_v41  ;;  %v1057_v50 = vpop.xlane.xlu1 %1056 }
 0x258   : > { %v1584_v8 = vrot.slane %v1057_v50, %v3069_v5  ;;  %v3725_v50 = vld [vmem:[#allocation13_spill] sm:$0xff] }
 0x259   : > { %v1580_v6 = vsel %vm1401_vm5, %v1579_v11, %v1575_v56  ;;  %1220 = vadd.xlane.f32.xlu0 %v972_v59  ;;  %v946_v11 = vsel %vm811_vm8, %v3273_v20, 0.0  ;;  %vm841_vm12 = vcmp.eq.s32.totalorder %v3725_v50, %v2693_v58  ;;  %v961_v59 = vsel %vm826_vm10, %v3273_v20, 0.0 }
 0x25a   : > { %v1585_v32 = vsel %vm1408_vm6, %v1584_v8, %v1580_v6  ;;  %1162 = vadd.xlane.f32.xlu1 %v943_v7  ;;  %v1059_v31 = vpop.xlane.xlu0 %1058  ;;  %v3726_v6 = vld [vmem:[#allocation36_spill] sm:$0xff] }
 0x25b   : > { %v1589_v54 = vrot.slane %v1059_v31, %v3084_v63  ;;  %v1061_v34 = vpop.xlane.xlu1 %1060  ;;  %vm812_vm15 = vcmp.eq.s32.totalorder %v3726_v6, %v2693_v58 }
 0x25c   : > { %v1594_v4 = vrot.slane %v1061_v34, %v3090_v13 }
 0x25d   : > { %v1590_v57 = vsel %vm1415_vm9, %v1589_v54, %v1585_v32  ;;  %1192 = vadd.xlane.f32.xlu0 %v958_v16  ;;  %v976_v16 = vsel %vm841_vm12, %v3273_v20, 0.0 }
 0x25e   : > { %v1595_v53 = vsel %vm3717_vm4, %v1594_v4, %v1590_v57  ;;  %1222 = vadd.xlane.f32.xlu1 %v973_v48  ;;  %v1063_v52 = vpop.xlane.xlu0 %1062  ;;  %vm3719_vm4 = vcmask 720512   ;;  %v3727_v57 = vld [vmem:[#allocation38_spill] sm:$0xff] }
 0x25f   : > { %v1599_v18 = vrot.slane %v1063_v52, %v3105_v39  ;;  %v1065_v17 = vpop.xlane.xlu1 %1064 }
 0x260   : > { %v1604_v0 = vrot.slane %v1065_v17, %v3111_v21 }
 0x261   : > { %v1600_v15 = vsel %vm3718_vm11, %v1599_v18, %v1595_v53  ;;  %1164 = vadd.xlane.f32.xlu0 %v944_v24  ;;  %vm3720_vm11 = vcmask 786112   ;;  %v3728_v53 = vld [vmem:[#allocation14_spill] sm:$0xff] }
 0x262   : > { %v1605_v60 = vsel %vm3719_vm4, %v1604_v0, %v1600_v15  ;;  %1194 = vadd.xlane.f32.xlu1 %v959_v62  ;;  %v1067_v46 = vpop.xlane.xlu0 %1066  ;;  %vm3722_vm4 = vcmask 851712   ;;  %vm842_vm8 = vcmp.eq.s32.totalorder %v3728_v53, %v2693_v58  ;;  %v3729_v62 = vld [vmem:[#allocation39_spill] sm:$0xff] }
 0x263   : > { %v1609_v49 = vrot.slane %v1067_v46, %v3126_v14  ;;  %v1069_v43 = vpop.xlane.xlu1 %1068  ;;  %vm828_vm10 = vcmp.eq.s32.totalorder %v3729_v62, %v2693_v58  ;;  %v977_v46 = vsel %vm842_vm8, %v3273_v20, 0.0  ;;  %vm3734_vm8 = vcmask 720512  }
 0x264   : > { %v1614_v44 = vrot.slane %v1069_v43, %v3132_v3  ;;  %v963_v35 = vsel %vm828_vm10, %v3273_v20, 0.0  ;;  %vm3735_vm10 = vcmask 786112  }
 0x265   : > { %v1610_v38 = vsel %vm3720_vm11, %v1609_v49, %v1605_v60  ;;  %1224 = vadd.xlane.f32.xlu0 %v974_v36  ;;  %vm2028_vm11 = vcmask 1042434   ;;  %v3730_v49 = vld [vmem:[#allocation15_spill] sm:$0xff] }
 0x266   : > { %v1615_v27 = vsel %vm3722_vm4, %v1614_v44, %v1610_v38  ;;  %1166 = vadd.xlane.f32.xlu1 %v945_v25  ;;  %v1071_v37 = vpop.xlane.xlu0 %1070  ;;  %vm827_vm4 = vcmp.eq.s32.totalorder %v3727_v57, %v2693_v58 }
 0x267   : > { %v1619_v47 = vrot.slane %v1071_v37, %v3147_v22  ;;  %v1073_v45 = vpop.xlane.xlu1 %1072  ;;  %v962_v15 = vsel %vm827_vm4, %v3273_v20, 0.0  ;;  %vm3733_vm4 = vcmask 654912  }
 0x268   : > { %v1624_v51 = vrot.slane %v1073_v45, %v3153_v55 }
 0x269   : > { %v1620_v26 = vsel %vm1457_vm3, %v1619_v47, %v1615_v27  ;;  %1196 = vadd.xlane.f32.xlu0 %v960_v9  ;;  %v3731_v27 = vld [vmem:[#allocation16_spill] sm:$0xff] }
 0x26a   : > { %v1625_v30 = vsel %vm1464_vm0, %v1624_v51, %v1620_v26  ;;  %1226 = vadd.xlane.f32.xlu1 %v975_v2  ;;  %v1075_v40 = vpop.xlane.xlu0 %1074  ;;  %vm844_vm12 = vcmp.eq.s32.totalorder %v3731_v27, %v2693_v58 }
 0x26b   : > { %v1629_v56 = vrot.slane %v1075_v40, %v3167_v33  ;;  %v1077_v19 = vpop.xlane.xlu1 %1076  ;;  %v979_v2 = vsel %vm844_vm12, %v3273_v20, 0.0  ;;  %vm2030_vm12 = vcmask 1043459  }
 0x26c   : > { %v1634_v31 = vrot.slane %v1077_v19, %v3023_v12 }
 0x26d   : > { %v1630_v8 = vsel %vm1471_vm7, %v1629_v56, %v1625_v30  ;;  %1168 = vadd.xlane.f32.xlu0 %v946_v11 }
 0x26e   : > { %v3352_v7 = vsel %vm2028_vm11, %v1630_v8, %v3268_v29  ;;  %1198 = vadd.xlane.f32.xlu1 %v961_v59  ;;  %v1079_v32 = vpop.xlane.xlu0 %1078  ;;  %v947_v29 = vsel %vm812_vm15, %v3273_v20, 0.0  ;;  %vm843_vm11 = vcmp.eq.s32.totalorder %v3730_v49, %v2693_v58  ;;  %vm3732_vm15 = vcmask 589312  }
 0x26f   : > { %v1638_v54 = vrot.slane %v1079_v32, %v3027_v61  ;;  %v1081_v34 = vpop.xlane.xlu1 %1080  ;;  %v978_v47 = vsel %vm843_vm11, %v3273_v20, 0.0  ;;  %vm3736_vm11 = vcmask 851712  }
 0x270   : > { %v1643_v4 = vrot.slane %v1081_v34, %v3032_v10 }
 0x271   : > { %v1639_v48 = vsel %vm1373_vm13, %v1638_v54, %v1634_v31  ;;  %1228 = vadd.xlane.f32.xlu0 %v976_v16 }
 0x272   : > { %v1644_v52 = vsel %vm1380_vm14, %v1643_v4, %v1639_v48  ;;  %1170 = vadd.xlane.f32.xlu1 %v947_v29  ;;  %v1083_v18 = vpop.xlane.xlu0 %1082 }
 0x273   : > { %v1648_v17 = vrot.slane %v1083_v18, %v3038_v42  ;;  %v1085_v0 = vpop.xlane.xlu1 %1084 }
 0x274   : > { %v1653_v24 = vrot.slane %v1085_v0, %v3044_v1 }
 0x275   : > { %v1649_v60 = vsel %vm1387_vm1, %v1648_v17, %v1644_v52  ;;  %1200 = vadd.xlane.f32.xlu0 %v962_v15 }
 0x276   : > { %v1654_v43 = vsel %vm1394_vm2, %v1653_v24, %v1649_v60  ;;  %1230 = vadd.xlane.f32.xlu1 %v977_v46  ;;  %v1087_v44 = vpop.xlane.xlu0 %1086 }
 0x277   : > { %v1658_v36 = vrot.slane %v1087_v44, %v3060_v41  ;;  %v1089_v38 = vpop.xlane.xlu1 %1088 }
 0x278   : > { %v1663_v25 = vrot.slane %v1089_v38, %v3069_v5 }
 0x279   : > { %v1659_v37 = vsel %vm1401_vm5, %v1658_v36, %v1654_v43  ;;  %1202 = vadd.xlane.f32.xlu0 %v963_v35 }
 0x27a   : > { %v1664_v45 = vsel %vm1408_vm6, %v1663_v25, %v1659_v37  ;;  %1232 = vadd.xlane.f32.xlu1 %v978_v47  ;;  %v1091_v51 = vpop.xlane.xlu0 %1090 }
 0x27b   : > { %v1668_v9 = vrot.slane %v1091_v51, %v3084_v63  ;;  %v1093_v28 = vpop.xlane.xlu1 %1092 }
 0x27c   : > { %v1673_v26 = vrot.slane %v1093_v28, %v3090_v13 }
 0x27d   : > { %v1669_v23 = vsel %vm1415_vm9, %v1668_v9, %v1664_v45  ;;  %1234 = vadd.xlane.f32.xlu0 %v979_v2 }
 0x27e   : > { %v1674_v58 = vsel %vm3732_vm15, %v1673_v26, %v1669_v23  ;;  %v1095_v30 = vpop.xlane.xlu0 %1094 }
 0x27f   : > { %v1678_v40 = vrot.slane %v1095_v30, %v3105_v39  ;;  %v1097_v56 = vpop.xlane.xlu1 %1096 }
 0x280   : > { %v1683_v19 = vrot.slane %v1097_v56, %v3111_v21 }
 0x281   : > { %v1679_v11 = vsel %vm3733_vm4, %v1678_v40, %v1674_v58 }
 0x282   : > { %v1684_v50 = vsel %vm3734_vm8, %v1683_v19, %v1679_v11  ;;  %v1099_v8 = vpop.xlane.xlu0 %1098 }
 0x283   : > { %v1688_v59 = vrot.slane %v1099_v8, %v3126_v14  ;;  %v1101_v6 = vpop.xlane.xlu1 %1100 }
 0x284   : > { %v1693_v20 = vrot.slane %v1101_v6, %v3132_v3 }
 0x285   : > { %v1689_v32 = vsel %vm3735_vm10, %v1688_v59, %v1684_v50 }
 0x286   : > { %v1694_v31 = vsel %vm3736_vm11, %v1693_v20, %v1689_v32  ;;  %v1103_v54 = vpop.xlane.xlu0 %1102 }
 0x287   : > { %v1698_v34 = vrot.slane %v1103_v54, %v3147_v22  ;;  %v1105_v4 = vpop.xlane.xlu1 %1104 }
 0x288   : > { %v1703_v16 = vrot.slane %v1105_v4, %v3153_v55 }
 0x289   : > { %v1699_v57 = vsel %vm1457_vm3, %v1698_v34, %v1694_v31 }
 0x28a   : > { %v1704_v48 = vsel %vm1464_vm0, %v1703_v16, %v1699_v57  ;;  %v1107_v29 = vpop.xlane.xlu0 %1106 }
 0x28b   : > { %v1708_v53 = vrot.slane %v1107_v29, %v3167_v33  ;;  %v1109_v52 = vpop.xlane.xlu1 %1108 }
 0x28c   : > { %v1713_v24 = vrot.slane %v1109_v52, %v3023_v12 }
 0x28d   : > { %v1709_v18 = vsel %vm1471_vm7, %v1708_v53, %v1704_v48 }
 0x28e   : > { %v2031_v17 = vsel %vm2030_vm12, %v1709_v18, %v3352_v7  ;;  %v1111_v0 = vpop.xlane.xlu0 %1110  ;;  %vm2032_vm12 = vcmask 1044484  }
 0x28f   : > { %v1717_v15 = vrot.slane %v1111_v0, %v3027_v61  ;;  %v1113_v62 = vpop.xlane.xlu1 %1112 }
 0x290   : > { %v1722_v60 = vrot.slane %v1113_v62, %v3032_v10 }
 0x291   : > { %v1718_v46 = vsel %vm1373_vm13, %v1717_v15, %v1713_v24 }
 0x292   : > { %v1723_v49 = vsel %vm1380_vm14, %v1722_v60, %v1718_v46  ;;  %v1115_v43 = vpop.xlane.xlu0 %1114 }
 0x293   : > { %v1727_v44 = vrot.slane %v1115_v43, %v3038_v42  ;;  %v1117_v36 = vpop.xlane.xlu1 %1116 }
 0x294   : > { %v1732_v38 = vrot.slane %v1117_v36, %v3044_v1 }
 0x295   : > { %v1728_v7 = vsel %vm1387_vm1, %v1727_v44, %v1723_v49 }
 0x296   : > { %v1733_v25 = vsel %vm1394_vm2, %v1732_v38, %v1728_v7  ;;  %v1119_v35 = vpop.xlane.xlu0 %1118 }
 0x297   : > { %v1737_v27 = vrot.slane %v1119_v35, %v3060_v41  ;;  %v1121_v37 = vpop.xlane.xlu1 %1120 }
 0x298   : > { %v1742_v47 = vrot.slane %v1121_v37, %v3069_v5 }
 0x299   : > { %v1738_v45 = vsel %vm1401_vm5, %v1737_v27, %v1733_v25 }
 0x29a   : > { %v1743_v51 = vsel %vm1408_vm6, %v1742_v47, %v1738_v45  ;;  %v1123_v9 = vpop.xlane.xlu0 %1122 }
 0x29b   : > { %v1747_v28 = vrot.slane %v1123_v9, %v3084_v63  ;;  %v1125_v26 = vpop.xlane.xlu1 %1124 }
 0x29c   : > { %v1752_v2 = vrot.slane %v1125_v26, %v3090_v13 }
 0x29d   : > { %v1748_v23 = vsel %vm1415_vm9, %v1747_v28, %v1743_v51 }
 0x29e   : > { %v1753_v58 = vsel %vm3732_vm15, %v1752_v2, %v1748_v23  ;;  %v1127_v30 = vpop.xlane.xlu0 %1126  ;;  %vm2034_vm15 = vcmask 1045509  }
 0x29f   : > { %v1757_v40 = vrot.slane %v1127_v30, %v3105_v39  ;;  %v1129_v56 = vpop.xlane.xlu1 %1128 }
 0x2a0   : > { %v1762_v19 = vrot.slane %v1129_v56, %v3111_v21 }
 0x2a1   : > { %v1758_v11 = vsel %vm3733_vm4, %v1757_v40, %v1753_v58 }
 0x2a2   : > { %v1763_v50 = vsel %vm3734_vm8, %v1762_v19, %v1758_v11  ;;  %v1131_v8 = vpop.xlane.xlu0 %1130 }
 0x2a3   : > { %v1767_v59 = vrot.slane %v1131_v8, %v3126_v14  ;;  %v1133_v6 = vpop.xlane.xlu1 %1132 }
 0x2a4   : > { %v1772_v20 = vrot.slane %v1133_v6, %v3132_v3 }
 0x2a5   : > { %v1768_v32 = vsel %vm3735_vm10, %v1767_v59, %v1763_v50 }
 0x2a6   : > { %v1773_v31 = vsel %vm3736_vm11, %v1772_v20, %v1768_v32  ;;  %v1135_v54 = vpop.xlane.xlu0 %1134 }
 0x2a7   : > { %v1777_v34 = vrot.slane %v1135_v54, %v3147_v22  ;;  %v1137_v4 = vpop.xlane.xlu1 %1136 }
 0x2a8   : > { %v1782_v16 = vrot.slane %v1137_v4, %v3153_v55 }
 0x2a9   : > { %v1778_v57 = vsel %vm1457_vm3, %v1777_v34, %v1773_v31 }
 0x2aa   : > { %v1783_v48 = vsel %vm1464_vm0, %v1782_v16, %v1778_v57  ;;  %v1139_v29 = vpop.xlane.xlu0 %1138 }
 0x2ab   : > { %v1787_v53 = vrot.slane %v1139_v29, %v3167_v33  ;;  %v1141_v52 = vpop.xlane.xlu1 %1140 }
 0x2ac   : > { %v1792_v15 = vrot.slane %v1141_v52, %v3023_v12 }
 0x2ad   : > { %v1788_v18 = vsel %vm1471_vm7, %v1787_v53, %v1783_v48 }
 0x2ae   : > { %v3434_v0 = vsel %vm2032_vm12, %v1788_v18, %v2031_v17  ;;  %v1143_v24 = vpop.xlane.xlu0 %1142 }
 0x2af   : > { %v1796_v62 = vrot.slane %v1143_v24, %v3027_v61  ;;  %v1145_v60 = vpop.xlane.xlu1 %1144 }
 0x2b0   : > { %v1801_v46 = vrot.slane %v1145_v60, %v3032_v10 }
 0x2b1   : > { %v1797_v49 = vsel %vm1373_vm13, %v1796_v62, %v1792_v15 }
 0x2b2   : > { %v1802_v43 = vsel %vm1380_vm14, %v1801_v46, %v1797_v49  ;;  %v1173_v44 = vpop.xlane.xlu0 %1172 }
 0x2b3   : > { %v1871_v36 = vrot.slane %v1173_v44, %v3023_v12  ;;  %v1175_v38 = vpop.xlane.xlu1 %1174 }
 0x2b4   : > { %v1875_v7 = vrot.slane %v1175_v38, %v3027_v61 }
 0x2b6   : > { %v1876_v17 = vsel %vm1373_vm13, %v1875_v7, %v1871_v36  ;;  %v1147_v25 = vpop.xlane.xlu0 %1146 }
 0x2b7   : > { %v1806_v35 = vrot.slane %v1147_v25, %v3038_v42  ;;  %v1177_v27 = vpop.xlane.xlu1 %1176 }
 0x2b8   : > { %v1880_v37 = vrot.slane %v1177_v27, %v3032_v10 }
 0x2b9   : > { %v1807_v47 = vsel %vm1387_vm1, %v1806_v35, %v1802_v43 }
 0x2ba   : > { %v1881_v45 = vsel %vm1380_vm14, %v1880_v37, %v1876_v17  ;;  %v1205_v51 = vpop.xlane.xlu0 %1204 }
 0x2bb   : > { %v1207_v9 = vpop.xlane.xlu1 %1206  ;;  %v1950_v24 = vrot.slane %v1205_v51, %v3023_v12 }
 0x2bc   : > { %v1954_v15 = vrot.slane %v1207_v9, %v3027_v61 }
 0x2be   : > { %v1149_v28 = vpop.xlane.xlu0 %1148  ;;  %v1955_v38 = vsel %vm1373_vm13, %v1954_v15, %v1950_v24  ;;  %vm3737_vm13 = vcmask 589312  }
 0x2bf   : > { %v1179_v26 = vpop.xlane.xlu1 %1178  ;;  %v1811_v62 = vrot.slane %v1149_v28, %v3044_v1 }
 0x2c0   : > { %v1885_v49 = vrot.slane %v1179_v26, %v3038_v42 }
 0x2c1   : > { %v1812_v7 = vsel %vm1394_vm2, %v1811_v62, %v1807_v47 }
 0x2c2   : > { %v1209_v2 = vpop.xlane.xlu0 %1208  ;;  %v1886_v37 = vsel %vm1387_vm1, %v1885_v49, %v1881_v45 }
 0x2c3   : > { %v1151_v23 = vpop.xlane.xlu1 %1150  ;;  %v1959_v17 = vrot.slane %v1209_v2, %v3032_v10 }
 0x2c4   : > { %v1816_v46 = vrot.slane %v1151_v23, %v3060_v41 }
 0x2c6   : > { %v1181_v58 = vpop.xlane.xlu0 %1180  ;;  %v1817_v25 = vsel %vm1401_vm5, %v1816_v46, %v1812_v7 }
 0x2c7   : > { %v1211_v30 = vpop.xlane.xlu1 %1210  ;;  %v1890_v35 = vrot.slane %v1181_v58, %v3044_v1 }
 0x2c8   : > { %v1964_v51 = vrot.slane %v1211_v30, %v3038_v42 }
 0x2ca   : > { %v1153_v40 = vpop.xlane.xlu0 %1152 }
 0x2cb   : > { %v1183_v56 = vpop.xlane.xlu1 %1182  ;;  %v1821_v43 = vrot.slane %v1153_v40, %v3069_v5 }
 0x2cc   : > { %v1895_v28 = vrot.slane %v1183_v56, %v3060_v41  ;;  %v1960_v56 = vsel %vm1380_vm14, %v1959_v17, %v1955_v38  ;;  %vm3738_vm14 = vmmov %vm3735_vm10 }
 0x2cd   : > { %v1822_v9 = vsel %vm1408_vm6, %v1821_v43, %v1817_v25  ;;  %vm3742_vm10 = vmmov %vm3734_vm8 }
 0x2ce   : > { %v1213_v19 = vpop.xlane.xlu0 %1212 }
 0x2cf   : > { %v1155_v11 = vpop.xlane.xlu1 %1154  ;;  %v1969_v26 = vrot.slane %v1213_v19, %v3044_v1  ;;  %v1891_v1 = vsel %vm1394_vm2, %v1890_v35, %v1886_v37 }
 0x2d0   : > { %v1826_v44 = vrot.slane %v1155_v11, %v3084_v63 }
 0x2d2   : > { %v3448_v50 = vpop.xlane.xlu0 %1184  ;;  %v1827_v10 = vsel %vm1415_vm9, %v1826_v44, %v1822_v9 }
 0x2d3   : > { %v3450_v8 = vpop.xlane.xlu1 %1214  ;;  %v1900_v58 = vrot.slane %v3448_v50, %v3069_v5 }
 0x2d4   : > { %v1974_v45 = vrot.slane %v3450_v8, %v3060_v41 }
 0x2d6   : > { %v1157_v59 = vpop.xlane.xlu0 %1156 }
 0x2d7   : > { %v3452_v6 = vpop.xlane.xlu1 %1186  ;;  %v1831_v12 = vrot.slane %v1157_v59, %v3090_v13  ;;  %v1965_v59 = vsel %vm1387_vm1, %v1964_v51, %v1960_v56  ;;  %vm3739_vm1 = vmmov %vm3736_vm11 }
 0x2d8   : > { %v1905_v50 = vrot.slane %v3452_v6, %v3084_v63  ;;  %vm3743_vm11 = vmmov %vm3738_vm14 }
 0x2d9   : > { %v1832_v42 = vsel %vm3737_vm13, %v1831_v12, %v1827_v10 }
 0x2da   : > { %v3454_v20 = vpop.xlane.xlu0 %1216 }
 0x2db   : > { %v1159_v32 = vpop.xlane.xlu1 %1158  ;;  %v1979_v49 = vrot.slane %v3454_v20, %v3069_v5 }
 0x2dc   : > { %v1836_v27 = vrot.slane %v1159_v32, %v3105_v39  ;;  %v1896_v32 = vsel %vm1401_vm5, %v1895_v28, %v1891_v1 }
 0x2dd   : > { %v1901_v15 = vsel %vm1408_vm6, %v1900_v58, %v1896_v32 }
 0x2de   : > { %v3456_v31 = vpop.xlane.xlu0 %1188  ;;  %v1837_v19 = vsel %vm3733_vm4, %v1836_v27, %v1832_v42  ;;  %v1906_v38 = vsel %vm1415_vm9, %v1905_v50, %v1901_v15 }
 0x2df   : > { %v3458_v54 = vpop.xlane.xlu1 %1218 }
 0x2e0   : > { %v1984_v7 = vrot.slane %v3458_v54, %v3084_v63 }
 0x2e2   : > { %v1161_v34 = vpop.xlane.xlu0 %1160 }
 0x2e3   : > { %v3460_v4 = vpop.xlane.xlu1 %1190  ;;  %v1841_v47 = vrot.slane %v1161_v34, %v3111_v21  ;;  %v1970_v34 = vsel %vm1394_vm2, %v1969_v26, %v1965_v59  ;;  %vm3740_vm2 = vmmov %vm3737_vm13 }
 0x2e4   : > { %v1975_v62 = vsel %vm1401_vm5, %v1974_v45, %v1970_v34  ;;  %v1915_v6 = vrot.slane %v3460_v4, %v3105_v39  ;;  %vm3741_vm5 = vmmov %vm3733_vm4 }
 0x2e5   : > { %v1842_v41 = vsel %vm3734_vm8, %v1841_v47, %v1837_v19  ;;  %v1980_v37 = vsel %vm1408_vm6, %v1979_v49, %v1975_v62  ;;  %vm3744_vm12 = vmmov %vm3740_vm2  ;;  %vm2036_vm6 = vcmask 1046534  }
 0x2e6   : > { %v3462_v16 = vpop.xlane.xlu0 %1220  ;;  %v1985_v51 = vsel %vm1415_vm9, %v1984_v7, %v1980_v37  ;;  %vm3746_vm13 = vmmov %vm3733_vm4 }
 0x2e7   : > { %v1163_v57 = vpop.xlane.xlu1 %1162  ;;  %v1989_v5 = vrot.slane %v3462_v16, %v3090_v13  ;;  %vm3747_vm9 = vmmov %vm3734_vm8 }
 0x2e8   : > { %v1846_v2 = vrot.slane %v1163_v57, %v3126_v14  ;;  %v1910_v57 = vrot.slane %v3456_v31, %v3090_v13  ;;  %vm3748_vm4 = vmmov %vm3743_vm11 }
 0x2e9   : > { %vm3749_vm8 = vmmov %vm3739_vm1 }
 0x2ea   : > { %v3464_v48 = vpop.xlane.xlu0 %1192  ;;  %v1911_v17 = vsel %vm3740_vm2, %v1910_v57, %v1906_v38 }
 0x2eb   : > { %v3466_v29 = vpop.xlane.xlu1 %1222  ;;  %v1920_v43 = vrot.slane %v3464_v48, %v3111_v21  ;;  %v1916_v35 = vsel %vm3741_vm5, %v1915_v6, %v1911_v17 }
 0x2ec   : > { %v1994_v63 = vrot.slane %v3466_v29, %v3105_v39  ;;  %v1990_v29 = vsel %vm3744_vm12, %v1989_v5, %v1985_v51 }
 0x2ed   : > { %v1921_v13 = vsel %vm3742_vm10, %v1920_v43, %v1916_v35 }
 0x2ee   : > { %v1165_v53 = vpop.xlane.xlu0 %1164 }
 0x2ef   : > { %v3468_v52 = vpop.xlane.xlu1 %1194  ;;  %v1851_v30 = vrot.slane %v1165_v53, %v3132_v3  ;;  %v1847_v53 = vsel %vm3738_vm14, %v1846_v2, %v1842_v41  ;;  %vm2038_vm14 = vcmask 1047559  }
 0x2f0   : > { %v1925_v4 = vrot.slane %v3468_v52, %v3126_v14 }
 0x2f2   : > { %v3470_v18 = vpop.xlane.xlu0 %1224  ;;  %v1926_v9 = vsel %vm3743_vm11, %v1925_v4, %v1921_v13 }
 0x2f3   : > { %v1167_v60 = vpop.xlane.xlu1 %1166  ;;  %v1999_v16 = vrot.slane %v3470_v18, %v3111_v21  ;;  %v1995_v21 = vsel %vm3746_vm13, %v1994_v63, %v1990_v29 }
 0x2f4   : > { %v1856_v11 = vrot.slane %v1167_v60, %v3147_v22  ;;  %v1852_v60 = vsel %vm3739_vm1, %v1851_v30, %v1847_v53 }
 0x2f6   : > { %v3479_v36 = vpop.xlane.xlu0 %1196  ;;  %v1857_v31 = vsel %vm1457_vm3, %v1856_v11, %v1852_v60 }
 0x2f7   : > { %v3484_v61 = vpop.xlane.xlu1 %1226  ;;  %v1930_v20 = vrot.slane %v3479_v36, %v3132_v3 }
 0x2f8   : > { %v2004_v39 = vrot.slane %v3484_v61, %v3126_v14  ;;  %v2000_v14 = vsel %vm3747_vm9, %v1999_v16, %v1995_v21 }
 0x2fa   : > { %v1169_v23 = vpop.xlane.xlu0 %1168 }
 0x2fb   : > { %v1199_v40 = vpop.xlane.xlu1 %1198  ;;  %v1861_v8 = vrot.slane %v1169_v23, %v3153_v55 }
 0x2fc   : > { %v1935_v54 = vrot.slane %v1199_v40, %v3147_v22 }
 0x2fd   : > { %v1862_v12 = vsel %vm1464_vm0, %v1861_v8, %v1857_v31 }
 0x2fe   : > { %v1229_v24 = vpop.xlane.xlu0 %1228 }
 0x2ff   : > { %v1171_v46 = vpop.xlane.xlu1 %1170  ;;  %v2009_v47 = vrot.slane %v1229_v24, %v3132_v3  ;;  %v2005_v3 = vsel %vm3748_vm4, %v2004_v39, %v2000_v14 }
 0x300   : > { %v1866_v44 = vrot.slane %v1171_v46, %v3167_v33 }
 0x301   : > { %v2010_v45 = vsel %vm3749_vm8, %v2009_v47, %v2005_v3 }
 0x302   : > { %v1867_v48 = vsel %vm1471_vm7, %v1866_v44, %v1862_v12  ;;  %v1201_v25 = vpop.xlane.xlu0 %1200 }
 0x303   : > { %v2035_v52 = vsel %vm2034_vm15, %v1867_v48, %v3434_v0  ;;  %v1231_v27 = vpop.xlane.xlu1 %1230  ;;  %v1940_v36 = vrot.slane %v1201_v25, %v3153_v55  ;;  %vm3745_vm15 = vmmov %vm3739_vm1 }
 0x304   : > { %v1931_v0 = vsel %vm3745_vm15, %v1930_v20, %v1926_v9  ;;  %v2014_v26 = vrot.slane %v1231_v27, %v3147_v22 }
 0x305   : > { %v1936_v18 = vsel %vm1457_vm3, %v1935_v54, %v1931_v0 }
 0x306   : > { %v1203_v28 = vpop.xlane.xlu0 %1202  ;;  %v1941_v61 = vsel %vm1464_vm0, %v1940_v36, %v1936_v18  ;;  %v2015_v22 = vsel %vm1457_vm3, %v2014_v26, %v2010_v45 }
 0x307   : > { %v1945_v10 = vrot.slane %v1203_v28, %v3167_v33  ;;  %v1233_v2 = vpop.xlane.xlu1 %1232 }
 0x308   : > { %v2019_v23 = vrot.slane %v1233_v2, %v3153_v55 }
 0x309   : > { %v1946_v58 = vsel %vm1471_vm7, %v1945_v10, %v1941_v61 }
 0x30a   : > { %v2037_v42 = vsel %vm2036_vm6, %v1946_v58, %v2035_v52  ;;  %v1235_v30 = vpop.xlane.xlu0 %1234  ;;  %v2020_v55 = vsel %vm1464_vm0, %v2019_v23, %v2015_v22 }
 0x30b   : > { %v2024_v40 = vrot.slane %v1235_v30, %v3167_v33 }
 0x30d   : > { %v2025_v56 = vsel %vm1471_vm7, %v2024_v40, %v2020_v55 }
 0x30e   : > { %v2039_v1 = vsel %vm2038_vm14, %v2025_v56, %v2037_v42 }
 0x30f   : > { %2041 = vst [vmem:[%s171_s17] sm:$0xff] %v2039_v1 }
 0x310   : > { %2285 = shalt.err (!%p2282_p10)
}
 0x311   : > { %s2286_s6 = scalar_lea.hbm %s3579_s29, 128  ;;  %s2290_s21 = scalar_lea.hbm %s3625_s2, 256 }
 0x312   : > { %p2287_p1 = scmp.ne.s32.totalorder %s3579_s29, %s2286_s6  ;;  %p2291_p3 = scmp.lt.u32.totalorder %s3579_s29, %s3625_s2 }
 0x313   : > { %p2292_p4 = scmp.lt.u32.totalorder %s2290_s21, %s2286_s6  ;;  %p2294_p6 = scmp.lt.u32.totalorder %s2286_s6, %s3579_s29 }
 0x314   : > { %p2288_p2 = pnand %p2287_p1, %p2454_p8 }
 0x315   : > { %p2293_p11 = por %p2292_p4, %p2291_p3 }
 0x316   : > { %p2289_p7 = pneg %p2288_p2 }
 0x317   : > { %p2295_p9 = por %p2294_p6, %p2293_p11 }
 0x319   : > { %p2296_p12 = pnand %p2295_p9, %p2289_p7 }
 0x31b   : > { %2299 = shalt.err (!%p2296_p12)
}
 0x31c   : > { %2162 = dma.vmem_to_hbm [thread:$0]  (%p2454_p8), %s3581_s24, 128, %s3579_s29, %s2043_s13  }
 0x31d PF: > { %s2068_s26 = sand.u32 1, %s2330_s9   ;;  %p3750_p13 = scmp.ne.s32.totalorder %s3641_s16, 0 }
 0x31e   : > { %p3751_p0 = scmp.ge.s32.totalorder %s2342_s12, 2  ;;  %s2069_s23 = scalar_lea.sflag [#allocation4], %s2068_s26 }
 0x320   : > { %p2173_p5 = pnand %p3751_p0, %p3750_p13 }
 0x322   : > { %2325 = dma.done.wait (!%p2173_p5), %s2069_s23, 128  }
 0x323   : > { %2327 = vsyncadd (!%p2173_p5), %s2069_s23, 4294967168  ;;  %p16_p10 = scmp.ge.s32.totalorder %s2410_s20, 4   ;;  %s3752_s9 = smov %s2334_s10 }
 0x324   : > { %s3753_s10 = smov %s2338_s11  ;;  %s3754_s11 = smov %s2446_s8 }
 0x325   : > { %s3755_s12 = smov %s2410_s20  ;;  %18 = sbr.rel (!%p16_p10) target bundleno = 6 (0x6), region = 78 }
 0x32c   :  { %2074 = vsyncpa [#allocation3], 1 }
 0x32d   :  { %2076 = vsyncpa [#allocation3 + $0x1], 1 }
 0x32e   :  { %2077 = vsyncpa [#allocation6], 1 }
 0x32f   :  { %2079 = vsyncpa [#allocation6 + $0x1], 1 }
 0x330   :  { %2080 = vsyncpa [#allocation4], 1 }
 0x331   :  { %2082 = vsyncpa [#allocation4 + $0x1], 1 }

</bundles_post_ra>
